<compile_context>
chip_gen: v6e
topology: v6e:2x2x1
jax: 0.10.0
libtpu: 0.0.40
codegen_flags: <defaults>
</compile_context>

<pallas_src>
import functools

import jax
import jax.numpy as jnp
from jax.experimental import pallas as pl
from jax.experimental.pallas import tpu as pltpu


def _attention_kernel(x_ref, ln_w_ref, ln_b_ref, w_qkv_ref, w_out_ref, o_ref,
                      q_scr, k_scr, v_scr, *, eps, heads, dim_head, q_tile):
    """One (batch, query-tile) grid step.

    x_ref     : (N, D)        f32  full sequence for this batch element
    ln_*      : (1, D)        f32  LayerNorm affine params
    w_qkv_ref : (D, 3*H*dh)   bf16 fused QKV weights (scale folded into Q cols)
    w_out_ref : (H, dh, D)    bf16 per-head output projection
    o_ref     : (TQ, D)       f32
    q/k/v_scr : (H, N, dh)    bf16 VMEM scratch, filled once per batch (qi==0)
    """
    qi = pl.program_id(1)
    inner = heads * dim_head

    @pl.when(qi == 0)
    def _():
        # LayerNorm in f32, then a single lane-dense bf16 MXU matmul for the
        # fused QKV projection; cached across all query tiles of this batch.
        x = x_ref[...]
        mean = jnp.mean(x, axis=-1, keepdims=True)
        xc = x - mean
        var = jnp.mean(xc * xc, axis=-1, keepdims=True)
        xn = (xc * jax.lax.rsqrt(var + eps)) * ln_w_ref[...] + ln_b_ref[...]
        xn = xn.astype(jnp.bfloat16)                                  # (N, D)

        qkv = jnp.dot(xn, w_qkv_ref[...],
                      preferred_element_type=jnp.float32)             # (N, 3*inner) f32
        qkv = qkv.astype(jnp.bfloat16)

        # One-time per-head relayout into the (H, N, dh) scratches.
        for h in range(heads):
            base = h * dim_head
            q_scr[h] = qkv[:, base:base + dim_head]
            k_scr[h] = qkv[:, inner + base:inner + base + dim_head]
            v_scr[h] = qkv[:, 2 * inner + base:2 * inner + base + dim_head]

    start = pl.multiple_of(qi * q_tile, q_tile)
    q = q_scr[:, pl.ds(start, q_tile), :]        # (H, TQ, dh) bf16 (pre-scaled)
    k = k_scr[...]                               # (H, N,  dh) bf16
    v = v_scr[...]                               # (H, N,  dh) bf16

    # Scores: batched MXU contraction over dim_head (no k transpose).
    s = jnp.einsum('hid,hjd->hij', q, k,
                   preferred_element_type=jnp.float32)                # (H, TQ, N) f32

    # Softmax in f32; reciprocal goes to the (otherwise idle) EUP slot.
    s = s - jnp.max(s, axis=-1, keepdims=True)
    p = jnp.exp(s)
    denom = jnp.sum(p, axis=-1, keepdims=True)
    p = (p * pl.reciprocal(denom, approx=True)).astype(jnp.bfloat16)  # (H, TQ, N)

    out = jnp.einsum('hij,hjd->hid', p, v,
                     preferred_element_type=jnp.float32).astype(jnp.bfloat16)  # (H, TQ, dh)

    # Output projection: contract heads via per-head matmuls accumulated in
    # f32 — no (H, TQ, D) f32 tile is materialized, no lane-concat relayout.
    acc = jnp.dot(out[0], w_out_ref[0], preferred_element_type=jnp.float32)
    for h in range(1, heads):
        acc = acc + jnp.dot(out[h], w_out_ref[h],
                            preferred_element_type=jnp.float32)
    o_ref[...] = acc                                                  # (TQ, D) f32


def prepare_attention_weights(w_qkv_t, w_out_t, *, heads, dim_head):
    """One-time host-side relayout: fold softmax scale into the Q columns,
    reshape W_out to per-head, cast MXU operands to bf16."""
    D = w_qkv_t.shape[0]
    inner = heads * dim_head
    assert w_qkv_t.shape == (D, 3 * inner)
    assert w_out_t.shape == (inner, D)
    scale = dim_head ** (-0.5)
    col_scale = jnp.concatenate([jnp.full((inner,), scale, jnp.float32),
                                 jnp.ones((2 * inner,), jnp.float32)])
    w_qkv = (w_qkv_t * col_scale[None, :]).astype(jnp.bfloat16)       # (D, 3*inner)
    w_out = w_out_t.reshape(heads, dim_head, D).astype(jnp.bfloat16)  # (H, dh, D)
    return w_qkv, w_out


def attention_pallas(x, ln_w, ln_b, w_qkv, w_out, *, heads, dim_head,
                     eps=1e-5, q_tile=None):
    """x: (B, N, D) f32.  w_qkv: (D, 3*H*dh) bf16 (prepared).  w_out: (H, dh, D) bf16."""
    B, N, D = x.shape
    inner = heads * dim_head
    assert w_qkv.shape == (D, 3 * inner)
    assert w_out.shape == (heads, dim_head, D)
    assert N % 8 == 0, "sequence length must be a multiple of 8 (sublane tile)"

    if q_tile is None:
        q_tile = min(N, 256)
    assert N % q_tile == 0 and q_tile % 8 == 0
    n_q_tiles = N // q_tile

    kernel = functools.partial(_attention_kernel, eps=eps, heads=heads,
                               dim_head=dim_head, q_tile=q_tile)

    const2 = lambda b, qi: (0, 0)
    const3 = lambda b, qi: (0, 0, 0)
    single = pl.Buffered(1)   # constant-index weight blocks: no double buffering

    return pl.pallas_call(
        kernel,
        out_shape=jax.ShapeDtypeStruct((B, N, D), jnp.float32),
        grid_spec=pltpu.PrefetchScalarGridSpec(
            num_scalar_prefetch=0,
            grid=(B, n_q_tiles),
            in_specs=[
                # full sequence of x for this batch element (index is qi-invariant,
                # so it is DMA'd once per batch element, not per query tile)
                pl.BlockSpec((pl.Squeezed(), N, D), lambda b, qi: (b, 0, 0)),
                pl.BlockSpec((1, D), const2, pipeline_mode=single),              # ln weight
                pl.BlockSpec((1, D), const2, pipeline_mode=single),              # ln bias
                pl.BlockSpec((D, 3 * inner), const2, pipeline_mode=single),      # fused W_qkv
                pl.BlockSpec((heads, dim_head, D), const3, pipeline_mode=single),  # W_out
            ],
            out_specs=pl.BlockSpec((pl.Squeezed(), q_tile, D),
                                   lambda b, qi: (b, qi, 0)),
            scratch_shapes=[
                pltpu.VMEM((heads, N, dim_head), jnp.bfloat16),   # q cache
                pltpu.VMEM((heads, N, dim_head), jnp.bfloat16),   # k cache
                pltpu.VMEM((heads, N, dim_head), jnp.bfloat16),   # v cache
            ],
        ),
        compiler_params=pltpu.CompilerParams(
            dimension_semantics=("parallel", "arbitrary"),
            vmem_limit_bytes=64 * 1024 * 1024),
    )(x, ln_w, ln_b, w_qkv, w_out)


def attention_reference(x, ln_w, ln_b, w_qkv_t, w_out_t, *, heads, dim_head, eps=1e-5):
    """Pure-JAX f32 reference mirroring the PyTorch forward."""
    B, N, D = x.shape
    inner = heads * dim_head
    mean = jnp.mean(x, axis=-1, keepdims=True)
    var = jnp.mean((x - mean) ** 2, axis=-1, keepdims=True)
    xn = (x - mean) / jnp.sqrt(var + eps) * ln_w + ln_b
    qkv = xn @ w_qkv_t                                            # (B, N, 3*inner)
    q, k, v = jnp.split(qkv, 3, axis=-1)

    def to_heads(t):
        return t.reshape(B, N, heads, dim_head).transpose(0, 2, 1, 3)  # b h n d

    q, k, v = map(to_heads, (q, k, v))
    q = q * (dim_head ** -0.5)
    sim = jnp.einsum('bhid,bhjd->bhij', q, k)
    attn = jax.nn.softmax(sim, axis=-1)
    out = jnp.einsum('bhij,bhjd->bhid', attn, v)
    out = out.transpose(0, 2, 1, 3).reshape(B, N, inner)
    return out @ w_out_t


if __name__ == "__main__":
    # Small shapes consistent with the module (nn defaults heads=8, dim_head=64),
    # D chosen lane-dense (128) so output stores are unmasked; 2 query tiles so
    # the qi==0 cache-fill + reuse path is exercised.
    B, N, D = 2, 16, 128
    heads, dim_head = 8, 64
    inner = heads * dim_head

    key = jax.random.PRNGKey(0)
    kx, kw1, kw2, kg, kb = jax.random.split(key, 5)

    x = jax.random.normal(kx, (B, N, D), dtype=jnp.float32)
    ln_w = 1.0 + 0.1 * jax.random.normal(kg, (1, D), dtype=jnp.float32)
    ln_b = 0.1 * jax.random.normal(kb, (1, D), dtype=jnp.float32)
    # Bias-free Linear layers, stored pre-transposed for row-major matmuls.
    w_qkv_t = jax.random.normal(kw1, (D, 3 * inner), dtype=jnp.float32) * (D ** -0.5)
    w_out_t = jax.random.normal(kw2, (inner, D), dtype=jnp.float32) * (inner ** -0.5)

    # Host-side weight relayout done ONCE, outside the per-forward path.
    w_qkv, w_out = prepare_attention_weights(w_qkv_t, w_out_t,
                                             heads=heads, dim_head=dim_head)

    fwd = jax.jit(functools.partial(attention_pallas, heads=heads,
                                    dim_head=dim_head, q_tile=8))
    out = jax.block_until_ready(fwd(x, ln_w, ln_b, w_qkv, w_out))

    ref = attention_reference(x, ln_w, ln_b, w_qkv_t, w_out_t,
                              heads=heads, dim_head=dim_head)
    assert out.shape == (B, N, D)
    # Tolerance accounts for bf16 MXU operands + approx reciprocal in the kernel
    # (reference is pure f32).
    assert jnp.allclose(out, ref, atol=5e-2, rtol=5e-2), "mismatch vs reference"

    print("KERNEL_OK")
</pallas_src>

<mosaic_0001>
module attributes {stable_mosaic.version = 11 : i64} {
  func.func @_attention_kernel(%arg0: i32, %arg1: i32, %arg2: memref<1x16x128xf32, #tpu.memory_space<vmem>>, %arg3: memref<1x128xf32, #tpu.memory_space<vmem>>, %arg4: memref<1x128xf32, #tpu.memory_space<vmem>>, %arg5: memref<128x1536xbf16, #tpu.memory_space<vmem>>, %arg6: memref<8x64x128xbf16, #tpu.memory_space<vmem>>, %arg7: memref<1x8x128xf32, #tpu.memory_space<vmem>>, %arg8: memref<8x16x64xbf16, #tpu.memory_space<vmem>>, %arg9: memref<8x16x64xbf16, #tpu.memory_space<vmem>>, %arg10: memref<8x16x64xbf16, #tpu.memory_space<vmem>>) attributes {dimension_semantics = [#tpu.dimension_semantics<parallel>, #tpu.dimension_semantics<arbitrary>], iteration_bounds = array<i64: 2, 2>, scalar_prefetch = 0 : i64, scratch_operands = 3 : i64, tpu.core_type = #tpu.core_type<tc>, window_params = [{transform_indices = @transform_0, window_bounds = array<i64: 1, 16, 128>}, {pipeline_mode = #tpu.pipeline_mode<synchronous>, transform_indices = @transform_1, window_bounds = array<i64: 1, 128>}, {pipeline_mode = #tpu.pipeline_mode<synchronous>, transform_indices = @transform_2, window_bounds = array<i64: 1, 128>}, {pipeline_mode = #tpu.pipeline_mode<synchronous>, transform_indices = @transform_3, window_bounds = array<i64: 128, 1536>}, {pipeline_mode = #tpu.pipeline_mode<synchronous>, transform_indices = @transform_4, window_bounds = array<i64: 8, 64, 128>}, {transform_indices = @transform_5, window_bounds = array<i64: 1, 8, 128>}]} {
    %c0_i32 = arith.constant 0 : i32
    %0 = arith.cmpi eq, %arg1, %c0_i32 : i32
    %1 = arith.extui %0 : i1 to i32
    %c0_i32_0 = arith.constant 0 : i32
    %2 = arith.cmpi ne, %1, %c0_i32_0 : i32
    scf.if %2 {
      %c0_39 = arith.constant 0 : index
      %c0_40 = arith.constant 0 : index
      %c0_41 = arith.constant 0 : index
      %73 = vector.load %arg2[%c0_39, %c0_40, %c0_41] : memref<1x16x128xf32, #tpu.memory_space<vmem>>, vector<1x16x128xf32>
      %74 = vector.shape_cast %73 : vector<1x16x128xf32> to vector<16x128xf32>
      %cst_42 = arith.constant dense<0.000000e+00> : vector<16xf32>
      %75 = vector.multi_reduction <add>, %74, %cst_42 [1] : vector<16x128xf32> to vector<16xf32>
      %76 = vector.shape_cast %75 : vector<16xf32> to vector<16x1xf32>
      %cst_43 = arith.constant 1.280000e+02 : f32
      %77 = vector.broadcast %cst_43 : f32 to vector<16x1xf32>
      %78 = arith.divf %76, %77 : vector<16x1xf32>
      %79 = vector.broadcast %78 : vector<16x1xf32> to vector<16x128xf32>
      %80 = arith.subf %74, %79 : vector<16x128xf32>
      %81 = arith.mulf %80, %80 : vector<16x128xf32>
      %cst_44 = arith.constant dense<0.000000e+00> : vector<16xf32>
      %82 = vector.multi_reduction <add>, %81, %cst_44 [1] : vector<16x128xf32> to vector<16xf32>
      %83 = vector.shape_cast %82 : vector<16xf32> to vector<16x1xf32>
      %cst_45 = arith.constant 1.280000e+02 : f32
      %84 = vector.broadcast %cst_45 : f32 to vector<16x1xf32>
      %85 = arith.divf %83, %84 : vector<16x1xf32>
      %cst_46 = arith.constant 9.99999974E-6 : f32
      %86 = vector.broadcast %cst_46 : f32 to vector<16x1xf32>
      %87 = arith.addf %85, %86 : vector<16x1xf32>
      %88 = math.rsqrt %87 : vector<16x1xf32>
      %89 = vector.broadcast %88 : vector<16x1xf32> to vector<16x128xf32>
      %90 = arith.mulf %80, %89 : vector<16x128xf32>
      %c0_47 = arith.constant 0 : index
      %c0_48 = arith.constant 0 : index
      %91 = vector.load %arg3[%c0_47, %c0_48] : memref<1x128xf32, #tpu.memory_space<vmem>>, vector<1x128xf32>
      %92 = vector.broadcast %91 : vector<1x128xf32> to vector<16x128xf32>
      %93 = arith.mulf %90, %92 : vector<16x128xf32>
      %c0_49 = arith.constant 0 : index
      %c0_50 = arith.constant 0 : index
      %94 = vector.load %arg4[%c0_49, %c0_50] : memref<1x128xf32, #tpu.memory_space<vmem>>, vector<1x128xf32>
      %95 = vector.broadcast %94 : vector<1x128xf32> to vector<16x128xf32>
      %96 = arith.addf %93, %95 : vector<16x128xf32>
      %97 = arith.truncf %96 : vector<16x128xf32> to vector<16x128xbf16>
      %c0_51 = arith.constant 0 : index
      %c0_52 = arith.constant 0 : index
      %98 = vector.load %arg5[%c0_51, %c0_52] : memref<128x1536xbf16, #tpu.memory_space<vmem>>, vector<128x1536xbf16>
      %cst_53 = arith.constant dense<0.000000e+00> : vector<16x1536xf32>
      %99 = tpu.matmul %97, %98, %cst_53 {dimension_numbers = #tpu.dot_dimension_numbers<[1], [0], [0], [1], [0, 0, 1, 1], [], []>} : vector<16x128xbf16>, vector<128x1536xbf16>, vector<16x1536xf32> -> vector<16x1536xf32>
      %100 = arith.truncf %99 : vector<16x1536xf32> to vector<16x1536xbf16>
      %101 = vector.extract_strided_slice %100 {offsets = [0, 0], sizes = [16, 64], strides = [1, 1]} : vector<16x1536xbf16> to vector<16x64xbf16>
      %c0_54 = arith.constant 0 : index
      %c0_55 = arith.constant 0 : index
      %c0_56 = arith.constant 0 : index
      %102 = vector.load %arg8[%c0_54, %c0_55, %c0_56] : memref<8x16x64xbf16, #tpu.memory_space<vmem>>, vector<1x16x64xbf16>
      %103 = vector.shape_cast %102 : vector<1x16x64xbf16> to vector<16x64xbf16>
      %104 = vector.shape_cast %101 : vector<16x64xbf16> to vector<1x16x64xbf16>
      tpu.vector_store %arg8[%c0_54, %c0_55, %c0_56], %104 {strides = array<i32>} : memref<8x16x64xbf16, #tpu.memory_space<vmem>>, vector<1x16x64xbf16>,
      %105 = vector.extract_strided_slice %100 {offsets = [0, 512], sizes = [16, 64], strides = [1, 1]} : vector<16x1536xbf16> to vector<16x64xbf16>
      %c0_57 = arith.constant 0 : index
      %c0_58 = arith.constant 0 : index
      %c0_59 = arith.constant 0 : index
      %106 = vector.load %arg9[%c0_57, %c0_58, %c0_59] : memref<8x16x64xbf16, #tpu.memory_space<vmem>>, vector<1x16x64xbf16>
      %107 = vector.shape_cast %106 : vector<1x16x64xbf16> to vector<16x64xbf16>
      %108 = vector.shape_cast %105 : vector<16x64xbf16> to vector<1x16x64xbf16>
      tpu.vector_store %arg9[%c0_57, %c0_58, %c0_59], %108 {strides = array<i32>} : memref<8x16x64xbf16, #tpu.memory_space<vmem>>, vector<1x16x64xbf16>,
      %109 = vector.extract_strided_slice %100 {offsets = [0, 1024], sizes = [16, 64], strides = [1, 1]} : vector<16x1536xbf16> to vector<16x64xbf16>
      %c0_60 = arith.constant 0 : index
      %c0_61 = arith.constant 0 : index
      %c0_62 = arith.constant 0 : index
      %110 = vector.load %arg10[%c0_60, %c0_61, %c0_62] : memref<8x16x64xbf16, #tpu.memory_space<vmem>>, vector<1x16x64xbf16>
      %111 = vector.shape_cast %110 : vector<1x16x64xbf16> to vector<16x64xbf16>
      %112 = vector.shape_cast %109 : vector<16x64xbf16> to vector<1x16x64xbf16>
      tpu.vector_store %arg10[%c0_60, %c0_61, %c0_62], %112 {strides = array<i32>} : memref<8x16x64xbf16, #tpu.memory_space<vmem>>, vector<1x16x64xbf16>,
      %113 = vector.extract_strided_slice %100 {offsets = [0, 64], sizes = [16, 64], strides = [1, 1]} : vector<16x1536xbf16> to vector<16x64xbf16>
      %c1_63 = arith.constant 1 : index
      %c0_64 = arith.constant 0 : index
      %c0_65 = arith.constant 0 : index
      %114 = vector.load %arg8[%c1_63, %c0_64, %c0_65] : memref<8x16x64xbf16, #tpu.memory_space<vmem>>, vector<1x16x64xbf16>
      %115 = vector.shape_cast %114 : vector<1x16x64xbf16> to vector<16x64xbf16>
      %116 = vector.shape_cast %113 : vector<16x64xbf16> to vector<1x16x64xbf16>
      tpu.vector_store %arg8[%c1_63, %c0_64, %c0_65], %116 {strides = array<i32>} : memref<8x16x64xbf16, #tpu.memory_space<vmem>>, vector<1x16x64xbf16>,
      %117 = vector.extract_strided_slice %100 {offsets = [0, 576], sizes = [16, 64], strides = [1, 1]} : vector<16x1536xbf16> to vector<16x64xbf16>
      %c1_66 = arith.constant 1 : index
      %c0_67 = arith.constant 0 : index
      %c0_68 = arith.constant 0 : index
      %118 = vector.load %arg9[%c1_66, %c0_67, %c0_68] : memref<8x16x64xbf16, #tpu.memory_space<vmem>>, vector<1x16x64xbf16>
      %119 = vector.shape_cast %118 : vector<1x16x64xbf16> to vector<16x64xbf16>
      %120 = vector.shape_cast %117 : vector<16x64xbf16> to vector<1x16x64xbf16>
      tpu.vector_store %arg9[%c1_66, %c0_67, %c0_68], %120 {strides = array<i32>} : memref<8x16x64xbf16, #tpu.memory_space<vmem>>, vector<1x16x64xbf16>,
      %121 = vector.extract_strided_slice %100 {offsets = [0, 1088], sizes = [16, 64], strides = [1, 1]} : vector<16x1536xbf16> to vector<16x64xbf16>
      %c1_69 = arith.constant 1 : index
      %c0_70 = arith.constant 0 : index
      %c0_71 = arith.constant 0 : index
      %122 = vector.load %arg10[%c1_69, %c0_70, %c0_71] : memref<8x16x64xbf16, #tpu.memory_space<vmem>>, vector<1x16x64xbf16>
      %123 = vector.shape_cast %122 : vector<1x16x64xbf16> to vector<16x64xbf16>
      %124 = vector.shape_cast %121 : vector<16x64xbf16> to vector<1x16x64xbf16>
      tpu.vector_store %arg10[%c1_69, %c0_70, %c0_71], %124 {strides = array<i32>} : memref<8x16x64xbf16, #tpu.memory_space<vmem>>, vector<1x16x64xbf16>,
      %125 = vector.extract_strided_slice %100 {offsets = [0, 128], sizes = [16, 64], strides = [1, 1]} : vector<16x1536xbf16> to vector<16x64xbf16>
      %c2_72 = arith.constant 2 : index
      %c0_73 = arith.constant 0 : index
      %c0_74 = arith.constant 0 : index
      %126 = vector.load %arg8[%c2_72, %c0_73, %c0_74] : memref<8x16x64xbf16, #tpu.memory_space<vmem>>, vector<1x16x64xbf16>
      %127 = vector.shape_cast %126 : vector<1x16x64xbf16> to vector<16x64xbf16>
      %128 = vector.shape_cast %125 : vector<16x64xbf16> to vector<1x16x64xbf16>
      tpu.vector_store %arg8[%c2_72, %c0_73, %c0_74], %128 {strides = array<i32>} : memref<8x16x64xbf16, #tpu.memory_space<vmem>>, vector<1x16x64xbf16>,
      %129 = vector.extract_strided_slice %100 {offsets = [0, 640], sizes = [16, 64], strides = [1, 1]} : vector<16x1536xbf16> to vector<16x64xbf16>
      %c2_75 = arith.constant 2 : index
      %c0_76 = arith.constant 0 : index
      %c0_77 = arith.constant 0 : index
      %130 = vector.load %arg9[%c2_75, %c0_76, %c0_77] : memref<8x16x64xbf16, #tpu.memory_space<vmem>>, vector<1x16x64xbf16>
      %131 = vector.shape_cast %130 : vector<1x16x64xbf16> to vector<16x64xbf16>
      %132 = vector.shape_cast %129 : vector<16x64xbf16> to vector<1x16x64xbf16>
      tpu.vector_store %arg9[%c2_75, %c0_76, %c0_77], %132 {strides = array<i32>} : memref<8x16x64xbf16, #tpu.memory_space<vmem>>, vector<1x16x64xbf16>,
      %133 = vector.extract_strided_slice %100 {offsets = [0, 1152], sizes = [16, 64], strides = [1, 1]} : vector<16x1536xbf16> to vector<16x64xbf16>
      %c2_78 = arith.constant 2 : index
      %c0_79 = arith.constant 0 : index
      %c0_80 = arith.constant 0 : index
      %134 = vector.load %arg10[%c2_78, %c0_79, %c0_80] : memref<8x16x64xbf16, #tpu.memory_space<vmem>>, vector<1x16x64xbf16>
      %135 = vector.shape_cast %134 : vector<1x16x64xbf16> to vector<16x64xbf16>
      %136 = vector.shape_cast %133 : vector<16x64xbf16> to vector<1x16x64xbf16>
      tpu.vector_store %arg10[%c2_78, %c0_79, %c0_80], %136 {strides = array<i32>} : memref<8x16x64xbf16, #tpu.memory_space<vmem>>, vector<1x16x64xbf16>,
      %137 = vector.extract_strided_slice %100 {offsets = [0, 192], sizes = [16, 64], strides = [1, 1]} : vector<16x1536xbf16> to vector<16x64xbf16>
      %c3_81 = arith.constant 3 : index
      %c0_82 = arith.constant 0 : index
      %c0_83 = arith.constant 0 : index
      %138 = vector.load %arg8[%c3_81, %c0_82, %c0_83] : memref<8x16x64xbf16, #tpu.memory_space<vmem>>, vector<1x16x64xbf16>
      %139 = vector.shape_cast %138 : vector<1x16x64xbf16> to vector<16x64xbf16>
      %140 = vector.shape_cast %137 : vector<16x64xbf16> to vector<1x16x64xbf16>
      tpu.vector_store %arg8[%c3_81, %c0_82, %c0_83], %140 {strides = array<i32>} : memref<8x16x64xbf16, #tpu.memory_space<vmem>>, vector<1x16x64xbf16>,
      %141 = vector.extract_strided_slice %100 {offsets = [0, 704], sizes = [16, 64], strides = [1, 1]} : vector<16x1536xbf16> to vector<16x64xbf16>
      %c3_84 = arith.constant 3 : index
      %c0_85 = arith.constant 0 : index
      %c0_86 = arith.constant 0 : index
      %142 = vector.load %arg9[%c3_84, %c0_85, %c0_86] : memref<8x16x64xbf16, #tpu.memory_space<vmem>>, vector<1x16x64xbf16>
      %143 = vector.shape_cast %142 : vector<1x16x64xbf16> to vector<16x64xbf16>
      %144 = vector.shape_cast %141 : vector<16x64xbf16> to vector<1x16x64xbf16>
      tpu.vector_store %arg9[%c3_84, %c0_85, %c0_86], %144 {strides = array<i32>} : memref<8x16x64xbf16, #tpu.memory_space<vmem>>, vector<1x16x64xbf16>,
      %145 = vector.extract_strided_slice %100 {offsets = [0, 1216], sizes = [16, 64], strides = [1, 1]} : vector<16x1536xbf16> to vector<16x64xbf16>
      %c3_87 = arith.constant 3 : index
      %c0_88 = arith.constant 0 : index
      %c0_89 = arith.constant 0 : index
      %146 = vector.load %arg10[%c3_87, %c0_88, %c0_89] : memref<8x16x64xbf16, #tpu.memory_space<vmem>>, vector<1x16x64xbf16>
      %147 = vector.shape_cast %146 : vector<1x16x64xbf16> to vector<16x64xbf16>
      %148 = vector.shape_cast %145 : vector<16x64xbf16> to vector<1x16x64xbf16>
      tpu.vector_store %arg10[%c3_87, %c0_88, %c0_89], %148 {strides = array<i32>} : memref<8x16x64xbf16, #tpu.memory_space<vmem>>, vector<1x16x64xbf16>,
      %149 = vector.extract_strided_slice %100 {offsets = [0, 256], sizes = [16, 64], strides = [1, 1]} : vector<16x1536xbf16> to vector<16x64xbf16>
      %c4_90 = arith.constant 4 : index
      %c0_91 = arith.constant 0 : index
      %c0_92 = arith.constant 0 : index
      %150 = vector.load %arg8[%c4_90, %c0_91, %c0_92] : memref<8x16x64xbf16, #tpu.memory_space<vmem>>, vector<1x16x64xbf16>
      %151 = vector.shape_cast %150 : vector<1x16x64xbf16> to vector<16x64xbf16>
      %152 = vector.shape_cast %149 : vector<16x64xbf16> to vector<1x16x64xbf16>
      tpu.vector_store %arg8[%c4_90, %c0_91, %c0_92], %152 {strides = array<i32>} : memref<8x16x64xbf16, #tpu.memory_space<vmem>>, vector<1x16x64xbf16>,
      %153 = vector.extract_strided_slice %100 {offsets = [0, 768], sizes = [16, 64], strides = [1, 1]} : vector<16x1536xbf16> to vector<16x64xbf16>
      %c4_93 = arith.constant 4 : index
      %c0_94 = arith.constant 0 : index
      %c0_95 = arith.constant 0 : index
      %154 = vector.load %arg9[%c4_93, %c0_94, %c0_95] : memref<8x16x64xbf16, #tpu.memory_space<vmem>>, vector<1x16x64xbf16>
      %155 = vector.shape_cast %154 : vector<1x16x64xbf16> to vector<16x64xbf16>
      %156 = vector.shape_cast %153 : vector<16x64xbf16> to vector<1x16x64xbf16>
      tpu.vector_store %arg9[%c4_93, %c0_94, %c0_95], %156 {strides = array<i32>} : memref<8x16x64xbf16, #tpu.memory_space<vmem>>, vector<1x16x64xbf16>,
      %157 = vector.extract_strided_slice %100 {offsets = [0, 1280], sizes = [16, 64], strides = [1, 1]} : vector<16x1536xbf16> to vector<16x64xbf16>
      %c4_96 = arith.constant 4 : index
      %c0_97 = arith.constant 0 : index
      %c0_98 = arith.constant 0 : index
      %158 = vector.load %arg10[%c4_96, %c0_97, %c0_98] : memref<8x16x64xbf16, #tpu.memory_space<vmem>>, vector<1x16x64xbf16>
      %159 = vector.shape_cast %158 : vector<1x16x64xbf16> to vector<16x64xbf16>
      %160 = vector.shape_cast %157 : vector<16x64xbf16> to vector<1x16x64xbf16>
      tpu.vector_store %arg10[%c4_96, %c0_97, %c0_98], %160 {strides = array<i32>} : memref<8x16x64xbf16, #tpu.memory_space<vmem>>, vector<1x16x64xbf16>,
      %161 = vector.extract_strided_slice %100 {offsets = [0, 320], sizes = [16, 64], strides = [1, 1]} : vector<16x1536xbf16> to vector<16x64xbf16>
      %c5_99 = arith.constant 5 : index
      %c0_100 = arith.constant 0 : index
      %c0_101 = arith.constant 0 : index
      %162 = vector.load %arg8[%c5_99, %c0_100, %c0_101] : memref<8x16x64xbf16, #tpu.memory_space<vmem>>, vector<1x16x64xbf16>
      %163 = vector.shape_cast %162 : vector<1x16x64xbf16> to vector<16x64xbf16>
      %164 = vector.shape_cast %161 : vector<16x64xbf16> to vector<1x16x64xbf16>
      tpu.vector_store %arg8[%c5_99, %c0_100, %c0_101], %164 {strides = array<i32>} : memref<8x16x64xbf16, #tpu.memory_space<vmem>>, vector<1x16x64xbf16>,
      %165 = vector.extract_strided_slice %100 {offsets = [0, 832], sizes = [16, 64], strides = [1, 1]} : vector<16x1536xbf16> to vector<16x64xbf16>
      %c5_102 = arith.constant 5 : index
      %c0_103 = arith.constant 0 : index
      %c0_104 = arith.constant 0 : index
      %166 = vector.load %arg9[%c5_102, %c0_103, %c0_104] : memref<8x16x64xbf16, #tpu.memory_space<vmem>>, vector<1x16x64xbf16>
      %167 = vector.shape_cast %166 : vector<1x16x64xbf16> to vector<16x64xbf16>
      %168 = vector.shape_cast %165 : vector<16x64xbf16> to vector<1x16x64xbf16>
      tpu.vector_store %arg9[%c5_102, %c0_103, %c0_104], %168 {strides = array<i32>} : memref<8x16x64xbf16, #tpu.memory_space<vmem>>, vector<1x16x64xbf16>,
      %169 = vector.extract_strided_slice %100 {offsets = [0, 1344], sizes = [16, 64], strides = [1, 1]} : vector<16x1536xbf16> to vector<16x64xbf16>
      %c5_105 = arith.constant 5 : index
      %c0_106 = arith.constant 0 : index
      %c0_107 = arith.constant 0 : index
      %170 = vector.load %arg10[%c5_105, %c0_106, %c0_107] : memref<8x16x64xbf16, #tpu.memory_space<vmem>>, vector<1x16x64xbf16>
      %171 = vector.shape_cast %170 : vector<1x16x64xbf16> to vector<16x64xbf16>
      %172 = vector.shape_cast %169 : vector<16x64xbf16> to vector<1x16x64xbf16>
      tpu.vector_store %arg10[%c5_105, %c0_106, %c0_107], %172 {strides = array<i32>} : memref<8x16x64xbf16, #tpu.memory_space<vmem>>, vector<1x16x64xbf16>,
      %173 = vector.extract_strided_slice %100 {offsets = [0, 384], sizes = [16, 64], strides = [1, 1]} : vector<16x1536xbf16> to vector<16x64xbf16>
      %c6_108 = arith.constant 6 : index
      %c0_109 = arith.constant 0 : index
      %c0_110 = arith.constant 0 : index
      %174 = vector.load %arg8[%c6_108, %c0_109, %c0_110] : memref<8x16x64xbf16, #tpu.memory_space<vmem>>, vector<1x16x64xbf16>
      %175 = vector.shape_cast %174 : vector<1x16x64xbf16> to vector<16x64xbf16>
      %176 = vector.shape_cast %173 : vector<16x64xbf16> to vector<1x16x64xbf16>
      tpu.vector_store %arg8[%c6_108, %c0_109, %c0_110], %176 {strides = array<i32>} : memref<8x16x64xbf16, #tpu.memory_space<vmem>>, vector<1x16x64xbf16>,
      %177 = vector.extract_strided_slice %100 {offsets = [0, 896], sizes = [16, 64], strides = [1, 1]} : vector<16x1536xbf16> to vector<16x64xbf16>
      %c6_111 = arith.constant 6 : index
      %c0_112 = arith.constant 0 : index
      %c0_113 = arith.constant 0 : index
      %178 = vector.load %arg9[%c6_111, %c0_112, %c0_113] : memref<8x16x64xbf16, #tpu.memory_space<vmem>>, vector<1x16x64xbf16>
      %179 = vector.shape_cast %178 : vector<1x16x64xbf16> to vector<16x64xbf16>
      %180 = vector.shape_cast %177 : vector<16x64xbf16> to vector<1x16x64xbf16>
      tpu.vector_store %arg9[%c6_111, %c0_112, %c0_113], %180 {strides = array<i32>} : memref<8x16x64xbf16, #tpu.memory_space<vmem>>, vector<1x16x64xbf16>,
      %181 = vector.extract_strided_slice %100 {offsets = [0, 1408], sizes = [16, 64], strides = [1, 1]} : vector<16x1536xbf16> to vector<16x64xbf16>
      %c6_114 = arith.constant 6 : index
      %c0_115 = arith.constant 0 : index
      %c0_116 = arith.constant 0 : index
      %182 = vector.load %arg10[%c6_114, %c0_115, %c0_116] : memref<8x16x64xbf16, #tpu.memory_space<vmem>>, vector<1x16x64xbf16>
      %183 = vector.shape_cast %182 : vector<1x16x64xbf16> to vector<16x64xbf16>
      %184 = vector.shape_cast %181 : vector<16x64xbf16> to vector<1x16x64xbf16>
      tpu.vector_store %arg10[%c6_114, %c0_115, %c0_116], %184 {strides = array<i32>} : memref<8x16x64xbf16, #tpu.memory_space<vmem>>, vector<1x16x64xbf16>,
      %185 = vector.extract_strided_slice %100 {offsets = [0, 448], sizes = [16, 64], strides = [1, 1]} : vector<16x1536xbf16> to vector<16x64xbf16>
      %c7_117 = arith.constant 7 : index
      %c0_118 = arith.constant 0 : index
      %c0_119 = arith.constant 0 : index
      %186 = vector.load %arg8[%c7_117, %c0_118, %c0_119] : memref<8x16x64xbf16, #tpu.memory_space<vmem>>, vector<1x16x64xbf16>
      %187 = vector.shape_cast %186 : vector<1x16x64xbf16> to vector<16x64xbf16>
      %188 = vector.shape_cast %185 : vector<16x64xbf16> to vector<1x16x64xbf16>
      tpu.vector_store %arg8[%c7_117, %c0_118, %c0_119], %188 {strides = array<i32>} : memref<8x16x64xbf16, #tpu.memory_space<vmem>>, vector<1x16x64xbf16>,
      %189 = vector.extract_strided_slice %100 {offsets = [0, 960], sizes = [16, 64], strides = [1, 1]} : vector<16x1536xbf16> to vector<16x64xbf16>
      %c7_120 = arith.constant 7 : index
      %c0_121 = arith.constant 0 : index
      %c0_122 = arith.constant 0 : index
      %190 = vector.load %arg9[%c7_120, %c0_121, %c0_122] : memref<8x16x64xbf16, #tpu.memory_space<vmem>>, vector<1x16x64xbf16>
      %191 = vector.shape_cast %190 : vector<1x16x64xbf16> to vector<16x64xbf16>
      %192 = vector.shape_cast %189 : vector<16x64xbf16> to vector<1x16x64xbf16>
      tpu.vector_store %arg9[%c7_120, %c0_121, %c0_122], %192 {strides = array<i32>} : memref<8x16x64xbf16, #tpu.memory_space<vmem>>, vector<1x16x64xbf16>,
      %193 = vector.extract_strided_slice %100 {offsets = [0, 1472], sizes = [16, 64], strides = [1, 1]} : vector<16x1536xbf16> to vector<16x64xbf16>
      %c7_123 = arith.constant 7 : index
      %c0_124 = arith.constant 0 : index
      %c0_125 = arith.constant 0 : index
      %194 = vector.load %arg10[%c7_123, %c0_124, %c0_125] : memref<8x16x64xbf16, #tpu.memory_space<vmem>>, vector<1x16x64xbf16>
      %195 = vector.shape_cast %194 : vector<1x16x64xbf16> to vector<16x64xbf16>
      %196 = vector.shape_cast %193 : vector<16x64xbf16> to vector<1x16x64xbf16>
      tpu.vector_store %arg10[%c7_123, %c0_124, %c0_125], %196 {strides = array<i32>} : memref<8x16x64xbf16, #tpu.memory_space<vmem>>, vector<1x16x64xbf16>,
    } else {
    }
    %c8_i32 = arith.constant 8 : i32
    %3 = arith.muli %arg1, %c8_i32 : i32
    %4 = tpu.assume_multiple %3, 8 : i32
    %c0 = arith.constant 0 : index
    %5 = arith.index_cast %4 : i32 to index
    %c0_1 = arith.constant 0 : index
    %6 = vector.load %arg8[%c0, %5, %c0_1] : memref<8x16x64xbf16, #tpu.memory_space<vmem>>, vector<8x8x64xbf16>
    %c0_2 = arith.constant 0 : index
    %c0_3 = arith.constant 0 : index
    %c0_4 = arith.constant 0 : index
    %7 = vector.load %arg9[%c0_2, %c0_3, %c0_4] : memref<8x16x64xbf16, #tpu.memory_space<vmem>>, vector<8x16x64xbf16>
    %c0_5 = arith.constant 0 : index
    %c0_6 = arith.constant 0 : index
    %c0_7 = arith.constant 0 : index
    %8 = vector.load %arg10[%c0_5, %c0_6, %c0_7] : memref<8x16x64xbf16, #tpu.memory_space<vmem>>, vector<8x16x64xbf16>
    "tpu.trace_start"() <{level = 10 : i32, message = "hid,hjd->hij"}> : () -> ()
    %cst = arith.constant dense<0.000000e+00> : vector<8x8x16xf32>
    %9 = tpu.matmul %6, %7, %cst {dimension_numbers = #tpu.dot_dimension_numbers<[2], [2], [1], [1], [0, 0, 0, 1, 1, 1], [0], [0]>} : vector<8x8x64xbf16>, vector<8x16x64xbf16>, vector<8x8x16xf32> -> vector<8x8x16xf32>
    "tpu.trace_stop"() : () -> ()
    %cst_8 = arith.constant dense<0xFF800000> : vector<8x8xf32>
    %10 = vector.multi_reduction <maximumf>, %9, %cst_8 [2] : vector<8x8x16xf32> to vector<8x8xf32>
    %11 = vector.shape_cast %10 : vector<8x8xf32> to vector<8x8x1xf32>
    %12 = vector.broadcast %11 : vector<8x8x1xf32> to vector<8x8x16xf32>
    %13 = arith.subf %9, %12 : vector<8x8x16xf32>
    %14 = math.exp %13 : vector<8x8x16xf32>
    %cst_9 = arith.constant dense<0.000000e+00> : vector<8x8xf32>
    %15 = vector.multi_reduction <add>, %14, %cst_9 [2] : vector<8x8x16xf32> to vector<8x8xf32>
    %16 = vector.shape_cast %15 : vector<8x8xf32> to vector<8x8x1xf32>
    %17 = tpu.reciprocal %16 {approx = true} : vector<8x8x1xf32> -> vector<8x8x1xf32>
    %18 = vector.broadcast %17 : vector<8x8x1xf32> to vector<8x8x16xf32>
    %19 = arith.mulf %14, %18 : vector<8x8x16xf32>
    %20 = arith.truncf %19 : vector<8x8x16xf32> to vector<8x8x16xbf16>
    "tpu.trace_start"() <{level = 10 : i32, message = "hij,hjd->hid"}> : () -> ()
    %cst_10 = arith.constant dense<0.000000e+00> : vector<8x8x64xf32>
    %21 = tpu.matmul %20, %8, %cst_10 {dimension_numbers = #tpu.dot_dimension_numbers<[2], [1], [1], [2], [0, 0, 0, 1, 1, 2], [0], [0]>} : vector<8x8x16xbf16>, vector<8x16x64xbf16>, vector<8x8x64xf32> -> vector<8x8x64xf32>
    "tpu.trace_stop"() : () -> ()
    %22 = arith.truncf %21 : vector<8x8x64xf32> to vector<8x8x64xbf16>
    %23 = vector.extract_strided_slice %22 {offsets = [0, 0, 0], sizes = [1, 8, 64], strides = [1, 1, 1]} : vector<8x8x64xbf16> to vector<1x8x64xbf16>
    %24 = vector.shape_cast %23 : vector<1x8x64xbf16> to vector<8x64xbf16>
    %c0_11 = arith.constant 0 : index
    %c0_12 = arith.constant 0 : index
    %c0_13 = arith.constant 0 : index
    %25 = vector.load %arg6[%c0_11, %c0_12, %c0_13] : memref<8x64x128xbf16, #tpu.memory_space<vmem>>, vector<1x64x128xbf16>
    %26 = vector.shape_cast %25 : vector<1x64x128xbf16> to vector<64x128xbf16>
    %cst_14 = arith.constant dense<0.000000e+00> : vector<8x128xf32>
    %27 = tpu.matmul %24, %26, %cst_14 {dimension_numbers = #tpu.dot_dimension_numbers<[1], [0], [0], [1], [0, 0, 1, 1], [], []>} : vector<8x64xbf16>, vector<64x128xbf16>, vector<8x128xf32> -> vector<8x128xf32>
    %28 = vector.extract_strided_slice %22 {offsets = [1, 0, 0], sizes = [1, 8, 64], strides = [1, 1, 1]} : vector<8x8x64xbf16> to vector<1x8x64xbf16>
    %29 = vector.shape_cast %28 : vector<1x8x64xbf16> to vector<8x64xbf16>
    %c1 = arith.constant 1 : index
    %c0_15 = arith.constant 0 : index
    %c0_16 = arith.constant 0 : index
    %30 = vector.load %arg6[%c1, %c0_15, %c0_16] : memref<8x64x128xbf16, #tpu.memory_space<vmem>>, vector<1x64x128xbf16>
    %31 = vector.shape_cast %30 : vector<1x64x128xbf16> to vector<64x128xbf16>
    %cst_17 = arith.constant dense<0.000000e+00> : vector<8x128xf32>
    %32 = tpu.matmul %29, %31, %cst_17 {dimension_numbers = #tpu.dot_dimension_numbers<[1], [0], [0], [1], [0, 0, 1, 1], [], []>} : vector<8x64xbf16>, vector<64x128xbf16>, vector<8x128xf32> -> vector<8x128xf32>
    %33 = arith.addf %27, %32 : vector<8x128xf32>
    %34 = vector.extract_strided_slice %22 {offsets = [2, 0, 0], sizes = [1, 8, 64], strides = [1, 1, 1]} : vector<8x8x64xbf16> to vector<1x8x64xbf16>
    %35 = vector.shape_cast %34 : vector<1x8x64xbf16> to vector<8x64xbf16>
    %c2 = arith.constant 2 : index
    %c0_18 = arith.constant 0 : index
    %c0_19 = arith.constant 0 : index
    %36 = vector.load %arg6[%c2, %c0_18, %c0_19] : memref<8x64x128xbf16, #tpu.memory_space<vmem>>, vector<1x64x128xbf16>
    %37 = vector.shape_cast %36 : vector<1x64x128xbf16> to vector<64x128xbf16>
    %cst_20 = arith.constant dense<0.000000e+00> : vector<8x128xf32>
    %38 = tpu.matmul %35, %37, %cst_20 {dimension_numbers = #tpu.dot_dimension_numbers<[1], [0], [0], [1], [0, 0, 1, 1], [], []>} : vector<8x64xbf16>, vector<64x128xbf16>, vector<8x128xf32> -> vector<8x128xf32>
    %39 = arith.addf %33, %38 : vector<8x128xf32>
    %40 = vector.extract_strided_slice %22 {offsets = [3, 0, 0], sizes = [1, 8, 64], strides = [1, 1, 1]} : vector<8x8x64xbf16> to vector<1x8x64xbf16>
    %41 = vector.shape_cast %40 : vector<1x8x64xbf16> to vector<8x64xbf16>
    %c3 = arith.constant 3 : index
    %c0_21 = arith.constant 0 : index
    %c0_22 = arith.constant 0 : index
    %42 = vector.load %arg6[%c3, %c0_21, %c0_22] : memref<8x64x128xbf16, #tpu.memory_space<vmem>>, vector<1x64x128xbf16>
    %43 = vector.shape_cast %42 : vector<1x64x128xbf16> to vector<64x128xbf16>
    %cst_23 = arith.constant dense<0.000000e+00> : vector<8x128xf32>
    %44 = tpu.matmul %41, %43, %cst_23 {dimension_numbers = #tpu.dot_dimension_numbers<[1], [0], [0], [1], [0, 0, 1, 1], [], []>} : vector<8x64xbf16>, vector<64x128xbf16>, vector<8x128xf32> -> vector<8x128xf32>
    %45 = arith.addf %39, %44 : vector<8x128xf32>
    %46 = vector.extract_strided_slice %22 {offsets = [4, 0, 0], sizes = [1, 8, 64], strides = [1, 1, 1]} : vector<8x8x64xbf16> to vector<1x8x64xbf16>
    %47 = vector.shape_cast %46 : vector<1x8x64xbf16> to vector<8x64xbf16>
    %c4 = arith.constant 4 : index
    %c0_24 = arith.constant 0 : index
    %c0_25 = arith.constant 0 : index
    %48 = vector.load %arg6[%c4, %c0_24, %c0_25] : memref<8x64x128xbf16, #tpu.memory_space<vmem>>, vector<1x64x128xbf16>
    %49 = vector.shape_cast %48 : vector<1x64x128xbf16> to vector<64x128xbf16>
    %cst_26 = arith.constant dense<0.000000e+00> : vector<8x128xf32>
    %50 = tpu.matmul %47, %49, %cst_26 {dimension_numbers = #tpu.dot_dimension_numbers<[1], [0], [0], [1], [0, 0, 1, 1], [], []>} : vector<8x64xbf16>, vector<64x128xbf16>, vector<8x128xf32> -> vector<8x128xf32>
    %51 = arith.addf %45, %50 : vector<8x128xf32>
    %52 = vector.extract_strided_slice %22 {offsets = [5, 0, 0], sizes = [1, 8, 64], strides = [1, 1, 1]} : vector<8x8x64xbf16> to vector<1x8x64xbf16>
    %53 = vector.shape_cast %52 : vector<1x8x64xbf16> to vector<8x64xbf16>
    %c5 = arith.constant 5 : index
    %c0_27 = arith.constant 0 : index
    %c0_28 = arith.constant 0 : index
    %54 = vector.load %arg6[%c5, %c0_27, %c0_28] : memref<8x64x128xbf16, #tpu.memory_space<vmem>>, vector<1x64x128xbf16>
    %55 = vector.shape_cast %54 : vector<1x64x128xbf16> to vector<64x128xbf16>
    %cst_29 = arith.constant dense<0.000000e+00> : vector<8x128xf32>
    %56 = tpu.matmul %53, %55, %cst_29 {dimension_numbers = #tpu.dot_dimension_numbers<[1], [0], [0], [1], [0, 0, 1, 1], [], []>} : vector<8x64xbf16>, vector<64x128xbf16>, vector<8x128xf32> -> vector<8x128xf32>
    %57 = arith.addf %51, %56 : vector<8x128xf32>
    %58 = vector.extract_strided_slice %22 {offsets = [6, 0, 0], sizes = [1, 8, 64], strides = [1, 1, 1]} : vector<8x8x64xbf16> to vector<1x8x64xbf16>
    %59 = vector.shape_cast %58 : vector<1x8x64xbf16> to vector<8x64xbf16>
    %c6 = arith.constant 6 : index
    %c0_30 = arith.constant 0 : index
    %c0_31 = arith.constant 0 : index
    %60 = vector.load %arg6[%c6, %c0_30, %c0_31] : memref<8x64x128xbf16, #tpu.memory_space<vmem>>, vector<1x64x128xbf16>
    %61 = vector.shape_cast %60 : vector<1x64x128xbf16> to vector<64x128xbf16>
    %cst_32 = arith.constant dense<0.000000e+00> : vector<8x128xf32>
    %62 = tpu.matmul %59, %61, %cst_32 {dimension_numbers = #tpu.dot_dimension_numbers<[1], [0], [0], [1], [0, 0, 1, 1], [], []>} : vector<8x64xbf16>, vector<64x128xbf16>, vector<8x128xf32> -> vector<8x128xf32>
    %63 = arith.addf %57, %62 : vector<8x128xf32>
    %64 = vector.extract_strided_slice %22 {offsets = [7, 0, 0], sizes = [1, 8, 64], strides = [1, 1, 1]} : vector<8x8x64xbf16> to vector<1x8x64xbf16>
    %65 = vector.shape_cast %64 : vector<1x8x64xbf16> to vector<8x64xbf16>
    %c7 = arith.constant 7 : index
    %c0_33 = arith.constant 0 : index
    %c0_34 = arith.constant 0 : index
    %66 = vector.load %arg6[%c7, %c0_33, %c0_34] : memref<8x64x128xbf16, #tpu.memory_space<vmem>>, vector<1x64x128xbf16>
    %67 = vector.shape_cast %66 : vector<1x64x128xbf16> to vector<64x128xbf16>
    %cst_35 = arith.constant dense<0.000000e+00> : vector<8x128xf32>
    %68 = tpu.matmul %65, %67, %cst_35 {dimension_numbers = #tpu.dot_dimension_numbers<[1], [0], [0], [1], [0, 0, 1, 1], [], []>} : vector<8x64xbf16>, vector<64x128xbf16>, vector<8x128xf32> -> vector<8x128xf32>
    %69 = arith.addf %63, %68 : vector<8x128xf32>
    %c0_36 = arith.constant 0 : index
    %c0_37 = arith.constant 0 : index
    %c0_38 = arith.constant 0 : index
    %70 = vector.load %arg7[%c0_36, %c0_37, %c0_38] : memref<1x8x128xf32, #tpu.memory_space<vmem>>, vector<1x8x128xf32>
    %71 = vector.shape_cast %70 : vector<1x8x128xf32> to vector<8x128xf32>
    %72 = vector.shape_cast %69 : vector<8x128xf32> to vector<1x8x128xf32>
    tpu.vector_store %arg7[%c0_36, %c0_37, %c0_38], %72 {strides = array<i32>} : memref<1x8x128xf32, #tpu.memory_space<vmem>>, vector<1x8x128xf32>,
    return
  }
  func.func @transform_0(%arg0: i32, %arg1: i32) -> (i32, i32, i32) {
    %c0_i32 = arith.constant 0 : i32
    %c0_i32_0 = arith.constant 0 : i32
    %c0_i32_1 = arith.constant 0 : i32
    return %arg0, %c0_i32, %c0_i32_0 : i32, i32, i32
  }
  func.func @transform_1(%arg0: i32, %arg1: i32) -> (i32, i32) {
    %c0_i32 = arith.constant 0 : i32
    %c0_i32_0 = arith.constant 0 : i32
    %c0_i32_1 = arith.constant 0 : i32
    return %c0_i32, %c0_i32_0 : i32, i32
  }
  func.func @transform_2(%arg0: i32, %arg1: i32) -> (i32, i32) {
    %c0_i32 = arith.constant 0 : i32
    %c0_i32_0 = arith.constant 0 : i32
    %c0_i32_1 = arith.constant 0 : i32
    return %c0_i32, %c0_i32_0 : i32, i32
  }
  func.func @transform_3(%arg0: i32, %arg1: i32) -> (i32, i32) {
    %c0_i32 = arith.constant 0 : i32
    %c0_i32_0 = arith.constant 0 : i32
    %c0_i32_1 = arith.constant 0 : i32
    return %c0_i32, %c0_i32_0 : i32, i32
  }
  func.func @transform_4(%arg0: i32, %arg1: i32) -> (i32, i32, i32) {
    %c0_i32 = arith.constant 0 : i32
    %c0_i32_0 = arith.constant 0 : i32
    %c0_i32_1 = arith.constant 0 : i32
    %c0_i32_2 = arith.constant 0 : i32
    return %c0_i32, %c0_i32_0, %c0_i32_1 : i32, i32, i32
  }
  func.func @transform_5(%arg0: i32, %arg1: i32) -> (i32, i32, i32) {
    %c0_i32 = arith.constant 0 : i32
    %c0_i32_0 = arith.constant 0 : i32
    return %arg0, %arg1, %c0_i32 : i32, i32, i32
  }
}

</mosaic_0001>

<bundles_post_ra>
// kernel: attention_pallas.1
= control target key start
LH: loop header
LB: loop body
LE: loop exit
PB: predicated region body
PF: predicated region fallthrough
CT: control target
= control target key end

     0   :  { %s4727_s0 = inlined_call_operand.hbm [shape: f32[2,16,128], index: 0, kind: input, shape index: {}]   ;;  %s4728_s1 = inlined_call_operand.vmem [shape: f32[1,128], index: 1, kind: input, shape index: {}]   ;;  %s4729_s2 = inlined_call_operand.vmem [shape: f32[1,128], index: 2, kind: input, shape index: {}]   ;;  %s4730_s3 = inlined_call_operand.hbm [shape: bf16[128,1536], index: 3, kind: input, shape index: {}]   ;;  %s4731_s4 = inlined_call_operand.hbm [shape: bf16[8,64,128], index: 4, kind: input, shape index: {}]   ;;  %s4732_s5 = inlined_call_operand.hbm [shape: f32[2,16,128], index: 5, kind: output, shape index: {}]  }
   0x1   :  { %4743 = sst [smem:[#allocation21_spill]] %s4730_s3 }
   0x2   :  { %4744 = sst [smem:[#allocation22_spill]] %s4731_s4 }
   0x3   :  { %4745 = sst [smem:[#allocation23_spill]] %s4732_s5 }
   0x4   :  { %10 = vsyncpa [#allocation6], 0 }
   0x5   :  { %12 = vsyncpa [#allocation6 + $0x1], 0 }
   0x6   :  { %13 = vsyncpa [#allocation9], 0 }
   0x7   :  { %14 = vsyncpa [#allocation7], 0 }
   0x8   :  { %16 = vsyncpa [#allocation7 + $0x1], 0  ;;  %s4208_s18 = smov 0   ;;  %s4210_s19 = smov 0  }
   0x9   :  { %s4212_s20 = smov 0   ;;  %s4214_s21 = smov 0  }
   0xa   :  { %s4216_s22 = smov 0   ;;  %s4218_s23 = smov 0  }
   0xb   :  { %s4220_s24 = smov 0   ;;  %s4222_s25 = smov 0  }
   0xc   :  { %s4224_s26 = smov 0   ;;  %s4226_s27 = smov 0  }
   0xd   :  { %s4228_s28 = smov 0  }
   0xe LB: > { %4746 = sst [smem:[#allocation15_spill]] %s4122_s18  ;;  %s3092_s29 = sadd.s32 4294967295, %s4162_s28   ;;  %s4162_s28 = sphi %s4228_s28, %s22_s28   ;;  %s4158_s27 = sphi %s4226_s27, %s4782_s27   ;;  %s4154_s26 = sphi %s4224_s26, %s4781_s26   ;;  %s4150_s25 = sphi %s4222_s25, %s4780_s25   ;;  %s4146_s24 = sphi %s4220_s24, %s4772_s24   ;;  %s4142_s23 = sphi %s4218_s23, %s4779_s23   ;;  %s4138_s22 = sphi %s4216_s22, %s4778_s22   ;;  %s4134_s21 = sphi %s4214_s21, %s4777_s21   ;;  %s4130_s20 = sphi %s4212_s20, %s4776_s20   ;;  %s4126_s19 = sphi %s4210_s19, %s4775_s19   ;;  %s4122_s18 = sphi %s4208_s18, %s4774_s18  }
   0xf   : > { %4747 = sst [smem:[#allocation16_spill]] %s4150_s25  ;;  %s3093_s30 = sadd.s32 4294967294, %s4162_s28  }
  0x10   : > { %4748 = sst [smem:[#allocation17_spill]] %s4154_s26  ;;  %p54_p0 = scmp.ne.s32.totalorder %s4138_s22, %s4134_s21 }
  0x11   : > { %p4264_p1 = scmp.eq.s32.totalorder %s3092_s29, 0  ;;  %p163_p2 = scmp.ne.s32.totalorder %s4130_s20, %s4126_s19 }
  0x12   : > { %p164_p4 = scmp.eq.s32.totalorder %s3092_s29, 3  ;;  %p169_p5 = scmp.ne.s32.totalorder %s4126_s19, %s4122_s18 }
  0x13   : > { %s4749_s6 = scalar_select %p4264_p1, 1, 0 }
  0x14   : > { %p4273_p3 = por %p4264_p1, %p54_p0  ;;  %p170_p6 = scmp.eq.s32.totalorder %s3093_s30, 3 }
  0x15   : > { %p4279_p7 = por %p164_p4, %p163_p2  ;;  %p3094_p8 = scmp.ge.s32.totalorder %s4162_s28, 1 }
  0x16   : > { %p4284_p9 = por %p170_p6, %p169_p5  ;;  %p177_p10 = scmp.lt.s32.totalorder %s4162_s28, 5 }
  0x17   : > { %s4751_s9 = scalar_select %p4279_p7, 1, 0 }
  0x18   : > { %s4753_s10 = scalar_select %p4284_p9, 1, 0 }
  0x19   : > { %4752 = sst [smem:[#allocation18_spill]] %s4751_s9  ;;  %p4289_p11 = pnand %p3094_p8, %p177_p10 }
  0x1a   : > { %4754 = sst [smem:[#allocation19_spill]] %s4753_s10  ;;  %s4164_s12 = smov [#allocation8]  }
  0x1b   : > { %s195_s13 = sshll.u32 %s4164_s12, 4  ;;  %p3609_p12 = pneg %p4289_p11  ;;  %s196_s13 = int_to_ptr.vmem [resolvable:$true] %s195_s13 }
  0x1c   : > { %s4165_s15 = smov [#allocation10]   ;;  %s3969_s17 = scalar_lea.vmem %s196_s13, 12288 }
  0x1d   : > { %p4297_p13 = pnand %p3609_p12, %p4264_p1  ;;  %s208_s16 = sshll.u32 %s4165_s15, 4  ;;  %s209_s16 = int_to_ptr.vmem [resolvable:$true] %s208_s16 }
  0x1e   : > { %p3970_p2 = scmp.ne.s32.totalorder %s196_s13, %s3969_s17  ;;  %p3977_p6 = scmp.lt.s32.totalorder %s196_s13, %s196_s13 }
  0x1f   : > { %p3960_p0 = pneg %p4297_p13  ;;  %p3978_p8 = scmp.lt.s32.totalorder %s3969_s17, %s3969_s17 }
  0x21   : > { %p3972_p4 = pnand %p3970_p2, %p3960_p0  ;;  %p3979_p10 = por %p3978_p8, %p3977_p6 }
  0x23   : > { %p3973_p5 = pneg %p3972_p4 }
  0x25   : > { %p3980_p12 = pnand %p3979_p10, %p3973_p5 }
  0x27   : > { %3983 = shalt.err (!%p3980_p12)
}
  0x28   : > { %s4166_s21 = smov 768   ;;  %s4167_s29 = smov 48  }
  0x29   : > { %s4757_s3 = sld [smem:[#allocation21_spill]]  ;;  %s3995_s15 = scalar_lea.vmem %s209_s16, 4096 }
  0x2a   : > { %p3996_p9 = scmp.ne.s32.totalorder %s209_s16, %s3995_s15  ;;  %p4003_p7 = scmp.lt.s32.totalorder %s209_s16, %s209_s16 }
  0x2b   : > { %p4004_p1 = scmp.lt.s32.totalorder %s3995_s15, %s3995_s15 }
  0x2c   : > { %p3998_p2 = pnand %p3996_p9, %p3960_p0 }
  0x2d   : > { %p4005_p6 = por %p4004_p1, %p4003_p7 }
  0x2e   : > { %p3999_p4 = pneg %p3998_p2 }
  0x2f   : > { %3612 = dma.hbm_to_vmem [thread:$0]  (!%p4297_p13), %s4757_s3, 12288, %s196_s13, [#allocation9], %s4166_s21, %s4166_s21, %s4167_s29  }
  0x30   : > { %p4006_p5 = pnand %p4005_p6, %p3999_p4 }
  0x32   : > { %4009 = shalt.err (!%p4006_p5)
}
  0x33   : > { %s4168_s17 = smov 64   ;;  %s4169_s13 = smov 4  }
  0x34   : > { %s4758_s4 = sld [smem:[#allocation22_spill]]  ;;  %s31_s30 = sadd.s32 1, %s4154_s26 }
  0x35   : > { %s34_s12 = sadd.s32 1, %s4158_s27  ;;  %p32_p1 = scmp.ge.s32.totalorder %s31_s30, 2 }
  0x36   : > { %s41_s15 = sadd.s32 1, %s4142_s23  ;;  %p48_p7 = scmp.ne.s32.totalorder %s4142_s23, %s4138_s22 }
  0x37   : > { %p49_p9 = scmp.eq.s32.totalorder %s4162_s28, 0  ;;  %s4784_s30 = smov (%p32_p1, %s31_s30), 0 }
  0x38   : > { %4759 = sst [smem:[#allocation20_spill]] %s4784_s30  ;;  %s4786_s12 = smov (!%p32_p1, %s34_s12), %s4158_s27 }
  0x39   : > { %p4328_p0 = por %p49_p9, %p48_p7  ;;  %s149_s21 = ssub.s32 %s4154_s26, %s4784_s30 }
  0x3a   : > { %3615 = dma.hbm_to_vmem [thread:$0]  (!%p4297_p13), %s4758_s4, 4096, %s209_s16, [#allocation9], %s4168_s17, %s4168_s17, %s4169_s13  }
  0x3b   : > { %p36_p13 = scmp.ge.s32.totalorder %s4786_s12, 2  ;;  %p3626_p8 = scmp.lt.s32.totalorder %s4162_s28, 4 }
  0x3c   : > { %s222_s16 = sand.u32 1, %s4142_s23   ;;  %s3308_s17 = sshll.u32 %s4158_s27, 8 }
  0x3d   : > { %s4788_s12 = smov (%p36_p13, %s4786_s12), 0  ;;  %s3098_s13 = sshll.u32 %s222_s16, 4 }
  0x3e   : > { %s38_s29 = ssub.s32 %s4158_s27, %s4788_s12  ;;  %s232_s10 = scalar_lea.hbm %s4727_s0, %s3308_s17 }
  0x3f   : > { %p39_p10 = scmp.eq.s32.totalorder %s38_s29, 0  ;;  %s150_s7 = sor.u32 %s149_s21, %s38_s29 }
  0x40   : > { %p151_p12 = scmp.eq.s32.totalorder %s150_s7, 0  ;;  %s4761_s30 = sadd.s32 1, %s4130_s20 }
  0x41   : > { %s4345_s18 = scalar_select %p39_p10, %s4142_s23, %s41_s15  }
  0x42   : > { %s4350_s26 = scalar_select %p151_p12, %s4130_s20, %s4761_s30  }
  0x43   : > { %s226_s5 = scalar_lea.vmem [#allocation5], %s3098_s13  ;;  %p4356_p2 = pnand %p3626_p8, %p4328_p0 }
  0x44   : > { %s233_s9 = sshll.u32 %s226_s5, 4  ;;  %s223_s7 = scalar_lea.sflag [#allocation6], %s222_s16  ;;  %s234_s9 = int_to_ptr.vmem [resolvable:$true] %s233_s9 }
  0x45   : > { %p4012_p4 = pneg %p4356_p2  ;;  %s4023_s3 = scalar_lea.vmem %s234_s9, 256 }
  0x46   : > { %p4024_p6 = scmp.ne.s32.totalorder %s234_s9, %s4023_s3  ;;  %s4170_s4 = smov [#allocation5]  }
  0x47   : > { %s4028_s30 = sshll.u32 %s4170_s4, 4  ;;  %s4029_s30 = int_to_ptr.vmem [resolvable:$false] %s4028_s30 }
  0x48   : > { %p4026_p5 = pnand %p4024_p6, %p4012_p4  ;;  %s4030_s15 = scalar_lea.vmem %s4029_s30, 512 }
  0x49   : > { %p4031_p7 = scmp.lt.s32.totalorder %s234_s9, %s4029_s30  ;;  %p4032_p9 = scmp.lt.s32.totalorder %s4030_s15, %s4023_s3 }
  0x4a   : > { %p4027_p1 = pneg %p4026_p5 }
  0x4b   : > { %p4033_p13 = por %p4032_p9, %p4031_p7 }
  0x4d   : > { %p4034_p0 = pnand %p4033_p13, %p4027_p1 }
  0x4f   : > { %4037 = shalt.err (!%p4034_p0)
}
  0x50   : > { %s4171_s5 = smov 128   ;;  %s4172_s14 = smov 8  }
  0x51   : > { %3619 = dma.hbm_to_vmem [thread:$0]  (!%p4356_p2), %s232_s10, 256, %s234_s9, %s223_s7, %s4171_s5, %s4171_s5, %s4172_s14  }
  0x52   : > { %245 = sbr.rel (%p4289_p11) target bundleno = 1776 (0x6f0), region = 40  ;;  %s247_s21 = sand.u32 (!%p4289_p11), 1, %s4138_s22  }
  0x53   : > { %s3102_s16 = sshll.u32 (!%p4289_p11), %s247_s21, 4  ;;  %s248_s17 = scalar_lea.sflag (!%p4289_p11), [#allocation6], %s247_s21 }
  0x54   : > { %s251_s13 = scalar_lea.vmem (!%p4289_p11), [#allocation5], %s3102_s16 }
  0x57   : > { %4109 = dma.done.wait (%p4273_p3), %s248_s17, 256  }
  0x58   : > { %4111 = vsyncadd (%p4273_p3), %s248_s17, 4294967040  ;;  %p4763_p8 = scmp.ne.s32.totalorder %s4749_s6, 0 }
  0x5a   : > { %4113 = dma.done.wait (%p4763_p8), [#allocation9], 16384  }
  0x5b   : > { %4115 = vsyncadd (%p4763_p8), [#allocation9], 4294950912  ;;  %s283_s25 = sand.u32 1, %s4126_s19   ;;  %p3106_p11 = scmp.ne.s32.totalorder %s4146_s24, 0 }
  0x5c   : > { %s4378_s9 = sshll.u32 %s283_s25, 3  ;;  %s4174_s7 = smov (!%p3106_p11), 64  }
  0x5d   : > { %s285_s10 = scalar_lea.vmem [#allocation11], %s4378_s9  ;;  %290 = sbr.rel (%p3106_p11) target bundleno = 802 (0x322), region = 56 }
  0x62   : > { %v291_v0 = vld [vmem:[%s251_s13] sm:$0xff]  ;;  %v292_v1 = vld [vmem:[%s251_s13 + $0x8] sm:$0xff]  ;;  %v4173_v44 = vmov 0   ;;  %vm1188_vm0 = vcmask 519168  }
  0x63   : > { %293 = vadd.xlane.f32.xlu0 %v291_v0  ;;  %v3730_v2 = vld [vmem:[#allocation8 + $0x2a4] ss:$48 sps:$4 sm:$0xff]   ;;  %v3732_v3 = vld [vmem:[#allocation8 + $0x2ac] ss:$48 sps:$4 sm:$0xff]   ;;  %v3734_v4 = vld [vmem:[#allocation8 + $0x2a0] ss:$48 sps:$4 sm:$0xff]   ;;  %943 = vmatprep.mubr.bf16.mxu0 %v4173_v44 }
  0x64   : > { %v3735_v5 = vld [vmem:[#allocation8 + $0x2a8] ss:$48 sps:$4 sm:$0xff]   ;;  %911 = vmatprep.subr.bf16.mxu0 %v3730_v2  ;;  %954 = vmatprep.subr.bf16.mxu1 %v3732_v3  ;;  %v3736_v14 = vld [vmem:[#allocation8 + $0x244] ss:$48 sps:$4 sm:$0xff]   ;;  %v3738_v15 = vld [vmem:[#allocation8 + $0x24c] ss:$48 sps:$4 sm:$0xff]  }
  0x65   : > { %912 = vmatpush1.bf16.msra.mxu0 %v3734_v4  ;;  %955 = vmatpush1.bf16.msra.mxu1 %v3735_v5  ;;  %v3740_v16 = vld [vmem:[#allocation8 + $0x240] ss:$48 sps:$4 sm:$0xff]   ;;  %v3741_v17 = vld [vmem:[#allocation8 + $0x248] ss:$48 sps:$4 sm:$0xff]   ;;  %v3742_v18 = vld [vmem:[#allocation8 + $0x1e4] ss:$48 sps:$4 sm:$0xff]  }
  0x66   : > { %913 = vmatprep.subr.bf16.mxu0 %v3736_v14  ;;  %956 = vmatprep.subr.bf16.mxu1 %v3738_v15  ;;  %v3744_v19 = vld [vmem:[#allocation8 + $0x1ec] ss:$48 sps:$4 sm:$0xff]   ;;  %v3746_v20 = vld [vmem:[#allocation8 + $0x1e0] ss:$48 sps:$4 sm:$0xff]   ;;  %v3747_v21 = vld [vmem:[#allocation8 + $0x1e8] ss:$48 sps:$4 sm:$0xff]  }
  0x67   : > { %295 = vadd.xlane.f32.xlu0 %v292_v1  ;;  %v3748_v22 = vld [vmem:[#allocation8 + $0x184] ss:$48 sps:$4 sm:$0xff]   ;;  %v3750_v23 = vld [vmem:[#allocation8 + $0x18c] ss:$48 sps:$4 sm:$0xff]   ;;  %v3752_v24 = vld [vmem:[#allocation8 + $0x180] ss:$48 sps:$4 sm:$0xff]   ;;  %986 = vmatprep.mubr.bf16.mxu1 %v4173_v44 }
  0x68   : > { %v3753_v25 = vld [vmem:[#allocation8 + $0x188] ss:$48 sps:$4 sm:$0xff]   ;;  %v3754_v26 = vld [vmem:[#allocation8 + $0x124] ss:$48 sps:$4 sm:$0xff]   ;;  %v3756_v27 = vld [vmem:[#allocation8 + $0x12c] ss:$48 sps:$4 sm:$0xff]  }
  0x69   : > { %914 = vmatpush1.bf16.msra.mxu0 %v3740_v16  ;;  %957 = vmatpush1.bf16.msra.mxu1 %v3741_v17  ;;  %v3758_v28 = vld [vmem:[#allocation8 + $0x120] ss:$48 sps:$4 sm:$0xff]   ;;  %v3759_v29 = vld [vmem:[#allocation8 + $0x128] ss:$48 sps:$4 sm:$0xff]   ;;  %v3760_v30 = vld [vmem:[#allocation8 + $0xc4] ss:$48 sps:$4 sm:$0xff]  }
  0x6a   : > { %915 = vmatprep.subr.bf16.mxu0 %v3742_v18  ;;  %958 = vmatprep.subr.bf16.mxu1 %v3744_v19  ;;  %v3762_v31 = vld [vmem:[#allocation8 + $0xcc] ss:$48 sps:$4 sm:$0xff]   ;;  %v3764_v32 = vld [vmem:[#allocation8 + $0xc0] ss:$48 sps:$4 sm:$0xff]   ;;  %v3765_v33 = vld [vmem:[#allocation8 + $0xc8] ss:$48 sps:$4 sm:$0xff]  }
  0x6b   : > { %v3766_v34 = vld [vmem:[#allocation8 + $0x64] ss:$48 sps:$4 sm:$0xff]   ;;  %v3768_v35 = vld [vmem:[#allocation8 + $0x6c] ss:$48 sps:$4 sm:$0xff]   ;;  %v3770_v36 = vld [vmem:[#allocation8 + $0x60] ss:$48 sps:$4 sm:$0xff]  }
  0x6c   : > { %v3771_v37 = vld [vmem:[#allocation8 + $0x68] ss:$48 sps:$4 sm:$0xff]   ;;  %v3772_v38 = vld [vmem:[#allocation8 + $0x4] ss:$48 sps:$4 sm:$0xff]   ;;  %v3774_v39 = vld [vmem:[#allocation8 + $0xc] ss:$48 sps:$4 sm:$0xff]  }
  0x6d   : > { %916 = vmatpush1.bf16.msra.mxu0 %v3746_v20  ;;  %959 = vmatpush1.bf16.msra.mxu1 %v3747_v21  ;;  %v3776_v40 = vld [vmem:[#allocation8] ss:$48 sps:$4 sm:$0xff]   ;;  %v3777_v41 = vld [vmem:[#allocation8 + $0x8] ss:$48 sps:$4 sm:$0xff]   ;;  %v3780_v42 = vld [vmem:[#allocation8 + $0x2b4] ss:$48 sps:$4 sm:$0xff]  }
  0x6e   : > { %917 = vmatprep.subr.bf16.mxu0 %v3748_v22  ;;  %960 = vmatprep.subr.bf16.mxu1 %v3750_v23  ;;  %v3783_v43 = vld [vmem:[#allocation8 + $0x2bc] ss:$48 sps:$4 sm:$0xff]   ;;  %v3107_v53 = vld [vmem:[%s4728_s1] ss:$0 sm:$0xff]  ;;  %v3781_v62 = vld [vmem:[#allocation8 + $0x2b8] ss:$48 sps:$4 sm:$0xff]  }
  0x6f   : > { %v3108_v57 = vld [vmem:[%s4729_s2] ss:$0 sm:$0xff]  ;;  %v3787_v3 = vld [vmem:[#allocation8 + $0x258] ss:$48 sps:$4 sm:$0xff]   ;;  %v3792_v4 = vld [vmem:[#allocation8 + $0x1f4] ss:$48 sps:$4 sm:$0xff]  }
  0x70   : > { %v3778_v61 = vld [vmem:[#allocation8 + $0x2b0] ss:$48 sps:$4 sm:$0xff]   ;;  %v3795_v5 = vld [vmem:[#allocation8 + $0x1fc] ss:$48 sps:$4 sm:$0xff]   ;;  %v3805_v15 = vld [vmem:[#allocation8 + $0x138] ss:$48 sps:$4 sm:$0xff]  }
  0x71   : > { %918 = vmatpush1.bf16.msra.mxu0 %v3752_v24  ;;  %961 = vmatpush1.bf16.msra.mxu1 %v3753_v25  ;;  %v3784_v2 = vld [vmem:[#allocation8 + $0x250] ss:$48 sps:$4 sm:$0xff]   ;;  %v3810_v16 = vld [vmem:[#allocation8 + $0xd4] ss:$48 sps:$4 sm:$0xff]   ;;  %v3813_v17 = vld [vmem:[#allocation8 + $0xdc] ss:$48 sps:$4 sm:$0xff]  }
  0x72   : > { %919 = vmatprep.subr.bf16.mxu0 %v3754_v26  ;;  %962 = vmatprep.subr.bf16.mxu1 %v3756_v27  ;;  %v3802_v14 = vld [vmem:[#allocation8 + $0x130] ss:$48 sps:$4 sm:$0xff]   ;;  %v3811_v19 = vld [vmem:[#allocation8 + $0xd8] ss:$48 sps:$4 sm:$0xff]   ;;  %v3816_v20 = vld [vmem:[#allocation8 + $0x74] ss:$48 sps:$4 sm:$0xff]  }
  0x73   : > { %v3808_v18 = vld [vmem:[#allocation8 + $0xd0] ss:$48 sps:$4 sm:$0xff]   ;;  %v3819_v21 = vld [vmem:[#allocation8 + $0x7c] ss:$48 sps:$4 sm:$0xff]   ;;  %v3817_v23 = vld [vmem:[#allocation8 + $0x78] ss:$48 sps:$4 sm:$0xff]  }
  0x74   : > { %v3814_v22 = vld [vmem:[#allocation8 + $0x70] ss:$48 sps:$4 sm:$0xff]   ;;  %v3822_v24 = vld [vmem:[#allocation8 + $0x14] ss:$48 sps:$4 sm:$0xff]   ;;  %v3825_v25 = vld [vmem:[#allocation8 + $0x1c] ss:$48 sps:$4 sm:$0xff]  }
  0x75   : > { %920 = vmatpush1.bf16.msra.mxu0 %v3758_v28  ;;  %963 = vmatpush1.bf16.msra.mxu1 %v3759_v29  ;;  %v3820_v26 = vld [vmem:[#allocation8 + $0x10] ss:$48 sps:$4 sm:$0xff]   ;;  %v3823_v27 = vld [vmem:[#allocation8 + $0x18] ss:$48 sps:$4 sm:$0xff]   ;;  %v3828_v28 = vld [vmem:[#allocation8 + $0x2c4] ss:$48 sps:$4 sm:$0xff]  }
  0x76   : > { %921 = vmatprep.subr.bf16.mxu0 %v3760_v30  ;;  %964 = vmatprep.subr.bf16.mxu1 %v3762_v31  ;;  %v3831_v29 = vld [vmem:[#allocation8 + $0x2cc] ss:$48 sps:$4 sm:$0xff]   ;;  %v3826_v30 = vld [vmem:[#allocation8 + $0x2c0] ss:$48 sps:$4 sm:$0xff]   ;;  %v3829_v31 = vld [vmem:[#allocation8 + $0x2c8] ss:$48 sps:$4 sm:$0xff]  }
  0x79   : > { %922 = vmatpush1.bf16.msra.mxu0 %v3764_v32  ;;  %965 = vmatpush1.bf16.msra.mxu1 %v3765_v33  ;;  %v3834_v32 = vld [vmem:[#allocation8 + $0x264] ss:$48 sps:$4 sm:$0xff]   ;;  %v3837_v33 = vld [vmem:[#allocation8 + $0x26c] ss:$48 sps:$4 sm:$0xff]  }
  0x7a   : > { %923 = vmatprep.subr.bf16.mxu0 %v3766_v34  ;;  %966 = vmatprep.subr.bf16.mxu1 %v3768_v35  ;;  %v3832_v34 = vld [vmem:[#allocation8 + $0x260] ss:$48 sps:$4 sm:$0xff]   ;;  %v3835_v35 = vld [vmem:[#allocation8 + $0x268] ss:$48 sps:$4 sm:$0xff]  }
  0x7d   : > { %924 = vmatpush1.bf16.msra.mxu0 %v3770_v36  ;;  %967 = vmatpush1.bf16.msra.mxu1 %v3771_v37  ;;  %v3840_v36 = vld [vmem:[#allocation8 + $0x204] ss:$48 sps:$4 sm:$0xff]   ;;  %v3843_v37 = vld [vmem:[#allocation8 + $0x20c] ss:$48 sps:$4 sm:$0xff]  }
  0x7e   : > { %925 = vmatprep.subr.bf16.mxu0 %v3772_v38  ;;  %968 = vmatprep.subr.bf16.mxu1 %v3774_v39  ;;  %v3838_v38 = vld [vmem:[#allocation8 + $0x200] ss:$48 sps:$4 sm:$0xff]   ;;  %v3841_v39 = vld [vmem:[#allocation8 + $0x208] ss:$48 sps:$4 sm:$0xff]  }
  0x81   : > { %926 = vmatpush1.bf16.msra.mxu0 %v3776_v40  ;;  %969 = vmatpush1.bf16.msra.mxu1 %v3777_v41  ;;  %v3846_v40 = vld [vmem:[#allocation8 + $0x1a4] ss:$48 sps:$4 sm:$0xff]   ;;  %v3849_v41 = vld [vmem:[#allocation8 + $0x1ac] ss:$48 sps:$4 sm:$0xff]  }
  0x82   : > { %997 = vmatprep.subr.bf16.mxu0 %v3780_v42  ;;  %1040 = vmatprep.subr.bf16.mxu1 %v3783_v43  ;;  %v3844_v42 = vld [vmem:[#allocation8 + $0x1a0] ss:$48 sps:$4 sm:$0xff]   ;;  %v3847_v43 = vld [vmem:[#allocation8 + $0x1a8] ss:$48 sps:$4 sm:$0xff]  }
  0xec   : > { %v294_v6 = vpop.xlane.xlu0 %293 }
  0xed   : > { %v298_v7 = vmul.f32 0.0078125, %v294_v6  ;;  %v3790_v6 = vld [vmem:[#allocation8 + $0x1f0] ss:$48 sps:$4 sm:$0xff]  }
  0xef   : > { %v4382_v8 = vsub.f32 %v291_v0, %v298_v7  ;;  %v3786_v0 = vld [vmem:[#allocation8 + $0x254] ss:$48 sps:$4 sm:$0xff]   ;;  %v3793_v7 = vld [vmem:[#allocation8 + $0x1f8] ss:$48 sps:$4 sm:$0xff]  }
  0xf0   : > { %v296_v9 = vpop.xlane.xlu0 %295 }
  0xf1   : > { %v299_v10 = vmul.f32 0.0078125, %v296_v9  ;;  %v302_v11 = vmul.f32 %v4382_v8, %v4382_v8  ;;  %v3801_v9 = vld [vmem:[#allocation8 + $0x19c] ss:$48 sps:$4 sm:$0xff]  }
  0xf3   : > { %v4386_v12 = vsub.f32 %v292_v1, %v299_v10  ;;  %304 = vadd.xlane.f32.xlu1 %v302_v11  ;;  %v3789_v1 = vld [vmem:[#allocation8 + $0x25c] ss:$48 sps:$4 sm:$0xff]   ;;  %v3796_v10 = vld [vmem:[#allocation8 + $0x190] ss:$48 sps:$4 sm:$0xff]   ;;  %v3799_v11 = vld [vmem:[#allocation8 + $0x198] ss:$48 sps:$4 sm:$0xff]  }
  0xf5   : > { %v303_v13 = vmul.f32 %v4386_v12, %v4386_v12 }
  0xf7   : > { %306 = vadd.xlane.f32.xlu1 %v303_v13  ;;  %v3807_v13 = vld [vmem:[#allocation8 + $0x13c] ss:$48 sps:$4 sm:$0xff]  }
 0x17c   : > { %v305_v45 = vpop.xlane.xlu1 %304 }
 0x17d   : > { %v308_v46 = vmul.f32 0.0078125, %v305_v45  ;;  %v3852_v45 = vld [vmem:[#allocation8 + $0x144] ss:$48 sps:$4 sm:$0xff]  }
 0x17f   : > { %v310_v47 = vadd.f32 1e-05, %v308_v46  ;;  %v3855_v46 = vld [vmem:[#allocation8 + $0x14c] ss:$48 sps:$4 sm:$0xff]  }
 0x180   : > { %v307_v48 = vpop.xlane.xlu1 %306 }
 0x181   : > { %3874 = vrsqrt.f32 %v310_v47  ;;  %v309_v49 = vmul.f32 0.0078125, %v307_v48  ;;  %v3850_v47 = vld [vmem:[#allocation8 + $0x140] ss:$48 sps:$4 sm:$0xff]   ;;  %v3858_v48 = vld [vmem:[#allocation8 + $0xe4] ss:$48 sps:$4 sm:$0xff]  }
 0x183   : > { %v311_v50 = vadd.f32 1e-05, %v309_v49  ;;  %v3861_v49 = vld [vmem:[#allocation8 + $0xec] ss:$48 sps:$4 sm:$0xff]  }
 0x185   : > { %3876 = vrsqrt.f32 %v311_v50  ;;  %v3856_v50 = vld [vmem:[#allocation8 + $0xe0] ss:$48 sps:$4 sm:$0xff]  }
 0x18e   : > { %v3875_v51 = vpop.eup %3874 }
 0x18f   : > { %v314_v52 = vmul.f32 %v3875_v51, %v4382_v8  ;;  %v3798_v8 = vld [vmem:[#allocation8 + $0x194] ss:$48 sps:$4 sm:$0xff]   ;;  %v3859_v51 = vld [vmem:[#allocation8 + $0xe8] ss:$48 sps:$4 sm:$0xff]  }
 0x191   : > { %v323_v55 = vmul.f32 %v3107_v53, %v314_v52  ;;  %v3864_v52 = vld [vmem:[#allocation8 + $0x84] ss:$48 sps:$4 sm:$0xff]  }
 0x192   : > { %v3877_v54 = vpop.eup %3876 }
 0x193   : > { %v315_v56 = vmul.f32 %v3877_v54, %v4386_v12  ;;  %v332_v59 = vadd.f32 %v3108_v57, %v323_v55  ;;  %v3804_v12 = vld [vmem:[#allocation8 + $0x134] ss:$48 sps:$4 sm:$0xff]   ;;  %v3862_v54 = vld [vmem:[#allocation8 + $0x80] ss:$48 sps:$4 sm:$0xff]   ;;  %v3865_v55 = vld [vmem:[#allocation8 + $0x88] ss:$48 sps:$4 sm:$0xff]  }
 0x195   : > { %v324_v58 = vmul.f32 %v3107_v53, %v315_v56  ;;  %v3867_v53 = vld [vmem:[#allocation8 + $0x8c] ss:$48 sps:$4 sm:$0xff]   ;;  %v3870_v56 = vld [vmem:[#allocation8 + $0x24] ss:$48 sps:$4 sm:$0xff]  }
 0x197   : > { %v333_v60 = vadd.f32 %v3108_v57, %v324_v58  ;;  %v3873_v57 = vld [vmem:[#allocation8 + $0x2c] ss:$48 sps:$4 sm:$0xff]   ;;  %v3868_v58 = vld [vmem:[#allocation8 + $0x20] ss:$48 sps:$4 sm:$0xff]  }
 0x199   : > { %v4400_v63 = vpack.c.bf16 %v333_v60, %v332_v59  ;;  %v3871_v59 = vld [vmem:[#allocation8 + $0x28] ss:$48 sps:$4 sm:$0xff]  }
 0x19b   : > { %944 = vmatmul.mubr.bf16.vlgmr.msra.gmra.mxu0 %v4400_v63  ;;  %987 = vmatmul.mubr.bf16.vlgmr.msra.gmra.mxu1 %v4400_v63 }
 0x19c   : > { %998 = vmatpush1.bf16.msra.mxu0 %v3778_v61  ;;  %1041 = vmatpush1.bf16.msra.mxu1 %v3781_v62 }
 0x19d   : > { %999 = vmatprep.subr.bf16.mxu0 %v3786_v0  ;;  %1042 = vmatprep.subr.bf16.mxu1 %v3789_v1 }
 0x19e   : > { %1029 = vmatprep.mubr.bf16.mxu0 %v4173_v44  ;;  %1072 = vmatprep.mubr.bf16.mxu1 %v4173_v44 }
 0x1a0   : > { %1000 = vmatpush1.bf16.msra.mxu0 %v3784_v2  ;;  %1043 = vmatpush1.bf16.msra.mxu1 %v3787_v3 }
 0x1a1   : > { %1001 = vmatprep.subr.bf16.mxu0 %v3792_v4  ;;  %1044 = vmatprep.subr.bf16.mxu1 %v3795_v5 }
 0x1a4   : > { %1002 = vmatpush1.bf16.msra.mxu0 %v3790_v6  ;;  %1045 = vmatpush1.bf16.msra.mxu1 %v3793_v7 }
 0x1a5   : > { %1003 = vmatprep.subr.bf16.mxu0 %v3798_v8  ;;  %1046 = vmatprep.subr.bf16.mxu1 %v3801_v9 }
 0x1a8   : > { %1004 = vmatpush1.bf16.msra.mxu0 %v3796_v10  ;;  %1047 = vmatpush1.bf16.msra.mxu1 %v3799_v11 }
 0x1a9   : > { %1005 = vmatprep.subr.bf16.mxu0 %v3804_v12  ;;  %1048 = vmatprep.subr.bf16.mxu1 %v3807_v13 }
 0x1ac   : > { %1006 = vmatpush1.bf16.msra.mxu0 %v3802_v14  ;;  %1049 = vmatpush1.bf16.msra.mxu1 %v3805_v15 }
 0x1ad   : > { %1007 = vmatprep.subr.bf16.mxu0 %v3810_v16  ;;  %1050 = vmatprep.subr.bf16.mxu1 %v3813_v17 }
 0x1b0   : > { %1008 = vmatpush1.bf16.msra.mxu0 %v3808_v18  ;;  %1051 = vmatpush1.bf16.msra.mxu1 %v3811_v19 }
 0x1b1   : > { %1009 = vmatprep.subr.bf16.mxu0 %v3816_v20  ;;  %1052 = vmatprep.subr.bf16.mxu1 %v3819_v21 }
 0x1b4   : > { %1010 = vmatpush1.bf16.msra.mxu0 %v3814_v22  ;;  %1053 = vmatpush1.bf16.msra.mxu1 %v3817_v23 }
 0x1b5   : > { %1011 = vmatprep.subr.bf16.mxu0 %v3822_v24  ;;  %1054 = vmatprep.subr.bf16.mxu1 %v3825_v25 }
 0x1b8   : > { %1012 = vmatpush1.bf16.msra.mxu0 %v3820_v26  ;;  %1055 = vmatpush1.bf16.msra.mxu1 %v3823_v27 }
 0x1b9   : > { %1083 = vmatprep.subr.bf16.mxu0 %v3828_v28  ;;  %1126 = vmatprep.subr.bf16.mxu1 %v3831_v29 }
 0x1bb   : > { %1030 = vmatmul.mubr.bf16.vlgmr.msra.gmra.mxu0 %v4400_v63  ;;  %1073 = vmatmul.mubr.bf16.vlgmr.msra.gmra.mxu1 %v4400_v63 }
 0x1bc   : > { %1084 = vmatpush1.bf16.msra.mxu0 %v3826_v30  ;;  %1127 = vmatpush1.bf16.msra.mxu1 %v3829_v31 }
 0x1bd   : > { %1085 = vmatprep.subr.bf16.mxu0 %v3834_v32  ;;  %1128 = vmatprep.subr.bf16.mxu1 %v3837_v33 }
 0x1be   : > { %1115 = vmatprep.mubr.bf16.mxu0 %v4173_v44  ;;  %1158 = vmatprep.mubr.bf16.mxu1 %v4173_v44  ;;  %v3853_v44 = vld [vmem:[#allocation8 + $0x148] ss:$48 sps:$4 sm:$0xff]  }
 0x1c0   : > { %1086 = vmatpush1.bf16.msra.mxu0 %v3832_v34  ;;  %1129 = vmatpush1.bf16.msra.mxu1 %v3835_v35 }
 0x1c1   : > { %1087 = vmatprep.subr.bf16.mxu0 %v3840_v36  ;;  %1130 = vmatprep.subr.bf16.mxu1 %v3843_v37 }
 0x1c4   : > { %1088 = vmatpush1.bf16.msra.mxu0 %v3838_v38  ;;  %1131 = vmatpush1.bf16.msra.mxu1 %v3841_v39 }
 0x1c5   : > { %1089 = vmatprep.subr.bf16.mxu0 %v3846_v40  ;;  %1132 = vmatprep.subr.bf16.mxu1 %v3849_v41 }
 0x1c8   : > { %1090 = vmatpush1.bf16.msra.mxu0 %v3844_v42  ;;  %1133 = vmatpush1.bf16.msra.mxu1 %v3847_v43 }
 0x1c9   : > { %1091 = vmatprep.subr.bf16.mxu0 %v3852_v45  ;;  %1134 = vmatprep.subr.bf16.mxu1 %v3855_v46 }
 0x1cc   : > { %1092 = vmatpush1.bf16.msra.mxu0 %v3850_v47  ;;  %1135 = vmatpush1.bf16.msra.mxu1 %v3853_v44 }
 0x1cd   : > { %1093 = vmatprep.subr.bf16.mxu0 %v3858_v48  ;;  %1136 = vmatprep.subr.bf16.mxu1 %v3861_v49 }
 0x1d0   : > { %1094 = vmatpush1.bf16.msra.mxu0 %v3856_v50  ;;  %1137 = vmatpush1.bf16.msra.mxu1 %v3859_v51 }
 0x1d1   : > { %1095 = vmatprep.subr.bf16.mxu0 %v3864_v52  ;;  %1138 = vmatprep.subr.bf16.mxu1 %v3867_v53 }
 0x1d4   : > { %1096 = vmatpush1.bf16.msra.mxu0 %v3862_v54  ;;  %1139 = vmatpush1.bf16.msra.mxu1 %v3865_v55 }
 0x1d5   : > { %1097 = vmatprep.subr.bf16.mxu0 %v3870_v56  ;;  %1140 = vmatprep.subr.bf16.mxu1 %v3873_v57 }
 0x1d8   : > { %1098 = vmatpush1.bf16.msra.mxu0 %v3868_v58  ;;  %1141 = vmatpush1.bf16.msra.mxu1 %v3871_v59 }
 0x1db   : > { %1116 = vmatmul.mubr.bf16.vlgmr.msra.gmra.mxu0 %v4400_v63  ;;  %1159 = vmatmul.mubr.bf16.vlgmr.msra.gmra.mxu1 %v4400_v63 }
 0x25b   : > { %v945_v60 = vpop.f32.mrf.mxu0  ;;  %v988_v61 = vpop.f32.mrf.mxu1 }
 0x25c   : > { %v3309_v62 = vpack.c.bf16 %v945_v60, %v945_v60  ;;  %v3321_v0 = vpack.c.bf16 %v988_v61, %v988_v61 }
 0x25d   : > { %v947_v1 = vpop.f32.mrf.mxu0  ;;  %v990_v2 = vpop.f32.mrf.mxu1 }
 0x25e   : > { %1189 = vst.msk [vmem:[#allocation2] sm:$0xf] %vm1188_vm0, %v3309_v62  ;;  %1301 = vst.msk [vmem:[#allocation2 + $0x20] sm:$0xf] %vm1188_vm0, %v3321_v0  ;;  %v3315_v3 = vpack.c.bf16 %v947_v1, %v947_v1  ;;  %v3327_v4 = vpack.c.bf16 %v990_v2, %v990_v2  ;;  %1209 = vrot.lane.b32.xlu0 %v3309_v62, %s4174_s7 }
 0x25f   : > { %v949_v5 = vpop.f32.mrf.mxu0  ;;  %v992_v6 = vpop.f32.mrf.mxu1 }
 0x260   : > { %1244 = vst.msk [vmem:[#allocation2 + $0x10] sm:$0xf] %vm1188_vm0, %v3315_v3  ;;  %1358 = vst.msk [vmem:[#allocation2 + $0x30] sm:$0xf] %vm1188_vm0, %v3327_v4  ;;  %v3310_v63 = vpack.c.bf16 %v949_v5, %v949_v5  ;;  %v3322_v7 = vpack.c.bf16 %v992_v6, %v992_v6 }
 0x261   : > { %v951_v8 = vpop.f32.mrf.mxu0  ;;  %v994_v9 = vpop.f32.mrf.mxu1 }
 0x262   : > { %1190 = vst.msk [vmem:[#allocation2 + $0x4] sm:$0xf] %vm1188_vm0, %v3310_v63  ;;  %1302 = vst.msk [vmem:[#allocation2 + $0x24] sm:$0xf] %vm1188_vm0, %v3322_v7  ;;  %v3316_v10 = vpack.c.bf16 %v951_v8, %v951_v8  ;;  %v3328_v11 = vpack.c.bf16 %v994_v9, %v994_v9  ;;  %1323 = vrot.lane.b32.xlu0 %v3321_v0, %s4174_s7  ;;  %1211 = vrot.lane.b32.xlu1 %v3310_v63, %s4174_s7 }
 0x264   : > { %1245 = vst.msk [vmem:[#allocation2 + $0x14] sm:$0xf] %vm1188_vm0, %v3316_v10  ;;  %1359 = vst.msk [vmem:[#allocation2 + $0x34] sm:$0xf] %vm1188_vm0, %v3328_v11 }
 0x266   : > { %1266 = vrot.lane.b32.xlu0 %v3315_v3, %s4174_s7  ;;  %1325 = vrot.lane.b32.xlu1 %v3322_v7, %s4174_s7 }
 0x26a   : > { %1380 = vrot.lane.b32.xlu0 %v3327_v4, %s4174_s7  ;;  %1268 = vrot.lane.b32.xlu1 %v3316_v10, %s4174_s7 }
 0x26e   : > { %1382 = vrot.lane.b32.xlu1 %v3328_v11, %s4174_s7 }
 0x27b   : > { %v1031_v12 = vpop.f32.mrf.mxu0  ;;  %v1074_v13 = vpop.f32.mrf.mxu1 }
 0x27c   : > { %v3311_v14 = vpack.c.bf16 %v1031_v12, %v1031_v12  ;;  %v3323_v15 = vpack.c.bf16 %v1074_v13, %v1074_v13 }
 0x27d   : > { %v1033_v16 = vpop.f32.mrf.mxu0  ;;  %v1076_v17 = vpop.f32.mrf.mxu1 }
 0x27e   : > { %1198 = vst.msk [vmem:[#allocation3] sm:$0xf] %vm1188_vm0, %v3311_v14  ;;  %1311 = vst.msk [vmem:[#allocation3 + $0x20] sm:$0xf] %vm1188_vm0, %v3323_v15  ;;  %v3317_v18 = vpack.c.bf16 %v1033_v16, %v1033_v16  ;;  %v3329_v19 = vpack.c.bf16 %v1076_v17, %v1076_v17  ;;  %1332 = vrot.lane.b32.xlu0 %v3323_v15, %s4174_s7  ;;  %1218 = vrot.lane.b32.xlu1 %v3311_v14, %s4174_s7 }
 0x27f   : > { %v1035_v20 = vpop.f32.mrf.mxu0  ;;  %v1078_v21 = vpop.f32.mrf.mxu1 }
 0x280   : > { %1254 = vst.msk [vmem:[#allocation3 + $0x10] sm:$0xf] %vm1188_vm0, %v3317_v18  ;;  %1368 = vst.msk [vmem:[#allocation3 + $0x30] sm:$0xf] %vm1188_vm0, %v3329_v19  ;;  %v3312_v22 = vpack.c.bf16 %v1035_v20, %v1035_v20  ;;  %v3324_v23 = vpack.c.bf16 %v1078_v21, %v1078_v21 }
 0x281   : > { %v1037_v24 = vpop.f32.mrf.mxu0  ;;  %v1080_v25 = vpop.f32.mrf.mxu1 }
 0x282   : > { %1199 = vst.msk [vmem:[#allocation3 + $0x4] sm:$0xf] %vm1188_vm0, %v3312_v22  ;;  %1312 = vst.msk [vmem:[#allocation3 + $0x24] sm:$0xf] %vm1188_vm0, %v3324_v23  ;;  %v3318_v26 = vpack.c.bf16 %v1037_v24, %v1037_v24  ;;  %v3330_v27 = vpack.c.bf16 %v1080_v25, %v1080_v25  ;;  %1275 = vrot.lane.b32.xlu0 %v3317_v18, %s4174_s7  ;;  %1220 = vrot.lane.b32.xlu1 %v3312_v22, %s4174_s7 }
 0x284   : > { %1255 = vst.msk [vmem:[#allocation3 + $0x14] sm:$0xf] %vm1188_vm0, %v3318_v26  ;;  %1369 = vst.msk [vmem:[#allocation3 + $0x34] sm:$0xf] %vm1188_vm0, %v3330_v27 }
 0x286   : > { %1389 = vrot.lane.b32.xlu0 %v3329_v19, %s4174_s7  ;;  %1334 = vrot.lane.b32.xlu1 %v3324_v23, %s4174_s7 }
 0x28a   : > { %1277 = vrot.lane.b32.xlu1 %v3318_v26, %s4174_s7 }
 0x28e   : > { %1391 = vrot.lane.b32.xlu1 %v3330_v27, %s4174_s7 }
 0x29b   : > { %v1117_v28 = vpop.f32.mrf.mxu0  ;;  %v1160_v29 = vpop.f32.mrf.mxu1 }
 0x29c   : > { %v3313_v30 = vpack.c.bf16 %v1117_v28, %v1117_v28  ;;  %v3325_v31 = vpack.c.bf16 %v1160_v29, %v1160_v29 }
 0x29d   : > { %v1119_v32 = vpop.f32.mrf.mxu0  ;;  %v1162_v33 = vpop.f32.mrf.mxu1 }
 0x29e   : > { %1207 = vst.msk [vmem:[#allocation4] sm:$0xf] %vm1188_vm0, %v3313_v30  ;;  %1321 = vst.msk [vmem:[#allocation4 + $0x20] sm:$0xf] %vm1188_vm0, %v3325_v31  ;;  %v3319_v34 = vpack.c.bf16 %v1119_v32, %v1119_v32  ;;  %v3331_v35 = vpack.c.bf16 %v1162_v33, %v1162_v33  ;;  %1227 = vrot.lane.b32.xlu0 %v3313_v30, %s4174_s7 }
 0x29f   : > { %v1121_v36 = vpop.f32.mrf.mxu0  ;;  %v1164_v37 = vpop.f32.mrf.mxu1 }
 0x2a0   : > { %1264 = vst.msk [vmem:[#allocation4 + $0x10] sm:$0xf] %vm1188_vm0, %v3319_v34  ;;  %1378 = vst.msk [vmem:[#allocation4 + $0x30] sm:$0xf] %vm1188_vm0, %v3331_v35  ;;  %v3314_v38 = vpack.c.bf16 %v1121_v36, %v1121_v36  ;;  %v3326_v39 = vpack.c.bf16 %v1164_v37, %v1164_v37 }
 0x2a1   : > { %v1123_v40 = vpop.f32.mrf.mxu0  ;;  %v1166_v41 = vpop.f32.mrf.mxu1 }
 0x2a2   : > { %1208 = vst.msk [vmem:[#allocation4 + $0x4] sm:$0xf] %vm1188_vm0, %v3314_v38  ;;  %1322 = vst.msk [vmem:[#allocation4 + $0x24] sm:$0xf] %vm1188_vm0, %v3326_v39  ;;  %v3320_v42 = vpack.c.bf16 %v1123_v40, %v1123_v40  ;;  %v3332_v43 = vpack.c.bf16 %v1166_v41, %v1166_v41  ;;  %1341 = vrot.lane.b32.xlu0 %v3325_v31, %s4174_s7  ;;  %1229 = vrot.lane.b32.xlu1 %v3314_v38, %s4174_s7 }
 0x2a4   : > { %1265 = vst.msk [vmem:[#allocation4 + $0x14] sm:$0xf] %vm1188_vm0, %v3320_v42  ;;  %1379 = vst.msk [vmem:[#allocation4 + $0x34] sm:$0xf] %vm1188_vm0, %v3332_v43 }
 0x2a6   : > { %1284 = vrot.lane.b32.xlu0 %v3319_v34, %s4174_s7  ;;  %1343 = vrot.lane.b32.xlu1 %v3326_v39, %s4174_s7 }
 0x2aa   : > { %1398 = vrot.lane.b32.xlu0 %v3331_v35, %s4174_s7  ;;  %1286 = vrot.lane.b32.xlu1 %v3320_v42, %s4174_s7 }
 0x2ae   : > { %1400 = vrot.lane.b32.xlu1 %v3332_v43, %s4174_s7 }
 0x2d0   : > { %v1210_v45 = vpop.permute.xlu0 %1209 }
 0x2d1   : > { %1216 = vst.msk [vmem:[#allocation2 + $0x8] sm:$0xf] %vm1188_vm0, %v1210_v45 }
 0x2d4   : > { %v1324_v46 = vpop.permute.xlu0 %1323  ;;  %v1212_v47 = vpop.permute.xlu1 %1211 }
 0x2d5   : > { %1330 = vst.msk [vmem:[#allocation2 + $0x28] sm:$0xf] %vm1188_vm0, %v1324_v46  ;;  %1217 = vst.msk [vmem:[#allocation2 + $0xc] sm:$0xf] %vm1188_vm0, %v1212_v47 }
 0x2d8   : > { %v1267_v44 = vpop.permute.xlu0 %1266  ;;  %v1326_v48 = vpop.permute.xlu1 %1325 }
 0x2d9   : > { %1273 = vst.msk [vmem:[#allocation2 + $0x18] sm:$0xf] %vm1188_vm0, %v1267_v44  ;;  %1331 = vst.msk [vmem:[#allocation2 + $0x2c] sm:$0xf] %vm1188_vm0, %v1326_v48 }
 0x2dc   : > { %v1381_v49 = vpop.permute.xlu0 %1380  ;;  %v1269_v50 = vpop.permute.xlu1 %1268 }
 0x2dd   : > { %1387 = vst.msk [vmem:[#allocation2 + $0x38] sm:$0xf] %vm1188_vm0, %v1381_v49  ;;  %1274 = vst.msk [vmem:[#allocation2 + $0x1c] sm:$0xf] %vm1188_vm0, %v1269_v50 }
 0x2e0   : > { %v1383_v51 = vpop.permute.xlu1 %1382 }
 0x2e1   : > { %1388 = vst.msk [vmem:[#allocation2 + $0x3c] sm:$0xf] %vm1188_vm0, %v1383_v51 }
 0x2f0   : > { %v1333_v52 = vpop.permute.xlu0 %1332  ;;  %v1219_v53 = vpop.permute.xlu1 %1218 }
 0x2f1   : > { %1339 = vst.msk [vmem:[#allocation3 + $0x28] sm:$0xf] %vm1188_vm0, %v1333_v52  ;;  %1225 = vst.msk [vmem:[#allocation3 + $0x8] sm:$0xf] %vm1188_vm0, %v1219_v53 }
 0x2f4   : > { %v1276_v54 = vpop.permute.xlu0 %1275  ;;  %v1221_v55 = vpop.permute.xlu1 %1220 }
 0x2f5   : > { %1282 = vst.msk [vmem:[#allocation3 + $0x18] sm:$0xf] %vm1188_vm0, %v1276_v54  ;;  %1226 = vst.msk [vmem:[#allocation3 + $0xc] sm:$0xf] %vm1188_vm0, %v1221_v55 }
 0x2f8   : > { %v1390_v56 = vpop.permute.xlu0 %1389  ;;  %v1335_v57 = vpop.permute.xlu1 %1334 }
 0x2f9   : > { %1396 = vst.msk [vmem:[#allocation3 + $0x38] sm:$0xf] %vm1188_vm0, %v1390_v56  ;;  %1340 = vst.msk [vmem:[#allocation3 + $0x2c] sm:$0xf] %vm1188_vm0, %v1335_v57 }
 0x2fc   : > { %v1278_v58 = vpop.permute.xlu1 %1277 }
 0x2fd   : > { %1283 = vst.msk [vmem:[#allocation3 + $0x1c] sm:$0xf] %vm1188_vm0, %v1278_v58 }
 0x300   : > { %v1392_v59 = vpop.permute.xlu1 %1391 }
 0x301   : > { %1397 = vst.msk [vmem:[#allocation3 + $0x3c] sm:$0xf] %vm1188_vm0, %v1392_v59 }
 0x310   : > { %v1228_v60 = vpop.permute.xlu0 %1227 }
 0x311   : > { %1234 = vst.msk [vmem:[#allocation4 + $0x8] sm:$0xf] %vm1188_vm0, %v1228_v60 }
 0x314   : > { %v1342_v61 = vpop.permute.xlu0 %1341  ;;  %v1230_v62 = vpop.permute.xlu1 %1229 }
 0x315   : > { %1348 = vst.msk [vmem:[#allocation4 + $0x28] sm:$0xf] %vm1188_vm0, %v1342_v61  ;;  %1235 = vst.msk [vmem:[#allocation4 + $0xc] sm:$0xf] %vm1188_vm0, %v1230_v62 }
 0x318   : > { %v1285_v0 = vpop.permute.xlu0 %1284  ;;  %v1344_v1 = vpop.permute.xlu1 %1343 }
 0x319   : > { %1291 = vst.msk [vmem:[#allocation4 + $0x18] sm:$0xf] %vm1188_vm0, %v1285_v0  ;;  %1349 = vst.msk [vmem:[#allocation4 + $0x2c] sm:$0xf] %vm1188_vm0, %v1344_v1 }
 0x31c   : > { %v1399_v2 = vpop.permute.xlu0 %1398  ;;  %v1287_v3 = vpop.permute.xlu1 %1286 }
 0x31d   : > { %1405 = vst.msk [vmem:[#allocation4 + $0x38] sm:$0xf] %vm1188_vm0, %v1399_v2  ;;  %1292 = vst.msk [vmem:[#allocation4 + $0x1c] sm:$0xf] %vm1188_vm0, %v1287_v3 }
 0x320   : > { %v1401_v4 = vpop.permute.xlu1 %1400 }
 0x321   : > { %1406 = vst.msk [vmem:[#allocation4 + $0x3c] sm:$0xf] %vm1188_vm0, %v1401_v4 }
 0x322 PF: > { %v3878_v5 = vld [vmem:[#allocation3] sm:$0xff]   ;;  %v4175_v6 = vmov 0.0   ;;  %vm1457_vm1 = vcmask 523264   ;;  %v3879_v63 = vld [vmem:[#allocation3 + $0x8] sm:$0xff]   ;;  %s3229_s3 = sshll.u32 %s4146_s24, 3  ;;  %vm4176_vm2 = vmmov 0  }
 0x323   : > { %3405 = vmatprep.subr.bf16.mxu0 %v4175_v6  ;;  %3411 = vmatprep.subr.bf16.mxu1 %v4175_v6  ;;  %v1462_v7 = vsel %vm1457_vm1, %v3878_v5, 0  ;;  %v1513_v8 = vsel %vm1457_vm1, %v3879_v63, 0  ;;  %s1408_s4 = sshra.s32 %s3229_s3, 3  ;;  %v3880_v9 = vld [vmem:[#allocation3 + $0x10] sm:$0xff]   ;;  %v3881_v10 = vld [vmem:[#allocation3 + $0x18] sm:$0xff]   ;;  %v3882_v11 = vld [vmem:[#allocation3 + $0x20] sm:$0xff]  }
 0x324   : > { %3406 = vmatpush3.bf16.xpose.msra.mxu0 %v1462_v7  ;;  %3407 = vmatprep.mubr.msk.bf16.mxu0 %vm4176_vm2, %v4175_v6  ;;  %s3230_s30 = sshll.u32 %s1408_s4, 2  ;;  %v3883_v13 = vld [vmem:[#allocation3 + $0x28] sm:$0xff]   ;;  %v1564_v15 = vsel %vm1457_vm1, %v3880_v9, 0  ;;  %v3884_v16 = vld [vmem:[#allocation3 + $0x30] sm:$0xff]   ;;  %v1615_v17 = vsel %vm1457_vm1, %v3881_v10, 0  ;;  %v3885_v18 = vld [vmem:[#allocation3 + $0x38] sm:$0xff]  }
 0x325   : > { %3412 = vmatpush3.bf16.xpose.msra.mxu1 %v1513_v8  ;;  %3413 = vmatprep.mubr.msk.bf16.mxu1 %vm4176_vm2, %v4175_v6  ;;  %s4495_s15 = scalar_lea.vmem [#allocation2], %s3230_s30  ;;  %v1666_v19 = vsel %vm1457_vm1, %v3882_v11, 0  ;;  %v1717_v20 = vsel %vm1457_vm1, %v3883_v13, 0  ;;  %v1768_v21 = vsel %vm1457_vm1, %v3884_v16, 0  ;;  %v1819_v22 = vsel %vm1457_vm1, %v3885_v18, 0  ;;  %s4764_s5 = sld [smem:[#allocation16_spill]] }
 0x326   : > { %3417 = vmatprep.subr.bf16.mxu0 %v4175_v6  ;;  %3423 = vmatprep.subr.bf16.mxu1 %v4175_v6  ;;  %v1412_v12 = vld [vmem:[%s4495_s15] sm:$0xf]  ;;  %v1413_v14 = vld [vmem:[%s4495_s15 + $0x8] sm:$0xf]  ;;  %v1414_v23 = vld [vmem:[%s4495_s15 + $0x10] sm:$0xf] }
 0x327   : > { %v1415_v24 = vld [vmem:[%s4495_s15 + $0x18] sm:$0xf]  ;;  %v1416_v25 = vld [vmem:[%s4495_s15 + $0x20] sm:$0xf]  ;;  %v1417_v26 = vld [vmem:[%s4495_s15 + $0x28] sm:$0xf] }
 0x328   : > { %v1418_v27 = vld [vmem:[%s4495_s15 + $0x30] sm:$0xf]  ;;  %v1419_v28 = vld [vmem:[%s4495_s15 + $0x38] sm:$0xf]  ;;  %vm1861_vm3 = vcmask 130048   ;;  %s4765_s16 = sld [smem:[#allocation18_spill]] }
 0x329   : > { %s2988_s13 = sshll.u32 %s285_s10, 4  ;;  %s4766_s11 = sld [smem:[#allocation23_spill]]  ;;  %s4664_s13 = int_to_ptr.vmem [resolvable:$true] %s2988_s13 }
 0x32a   : > { %s4038_s7 = scalar_lea.vmem %s4664_s13, 128  ;;  %s4177_s3 = smov [#allocation11]  }
 0x32b   : > { %3408 = vmatmul.mubr.msk.bf16.vlgmr.msra.gmra.mxu0 %vm1457_vm1, %v1412_v12  ;;  %s3304_s14 = sshll.u32 %s4764_s5, 1  ;;  %p4039_p3 = scmp.ne.s32.totalorder %s4664_s13, %s4038_s7 }
 0x32c   : > { %3414 = vmatmul.mubr.msk.bf16.vlgmr.msra.gmra.mxu1 %vm1457_vm1, %v1413_v14  ;;  %3418 = vmatpush3.bf16.xpose.msra.mxu0 %v1564_v15  ;;  %s2984_s21 = sadd.s32 %s4146_s24, %s3304_s14  ;;  %s2973_s24 = scalar_lea.sflag [#allocation7], %s283_s25 }
 0x32d   : > { %3424 = vmatpush3.bf16.xpose.msra.mxu1 %v1615_v17  ;;  %3419 = vmatprep.mubr.msk.bf16.mxu0 %vm4176_vm2, %v4175_v6  ;;  %s3305_s17 = sshll.u32 %s2984_s21, 7  ;;  %s4042_s4 = sshll.u32 %s4177_s3, 4  ;;  %s4043_s4 = int_to_ptr.vmem [resolvable:$false] %s4042_s4 }
 0x32e   : > { %3425 = vmatprep.mubr.msk.bf16.mxu1 %vm4176_vm2, %v4175_v6  ;;  %3429 = vmatprep.subr.bf16.mxu0 %v4175_v6  ;;  %p4767_p10 = scmp.ne.s32.totalorder %s4765_s16, 0  ;;  %s4044_s30 = scalar_lea.vmem %s4043_s4, 256 }
 0x32f   : > { %3435 = vmatprep.subr.bf16.mxu1 %v4175_v6  ;;  %s4662_s29 = scalar_lea.hbm %s4766_s11, %s3305_s17  ;;  %p4045_p4 = scmp.lt.s32.totalorder %s4664_s13, %s4043_s4 }
 0x330   : > { %p4040_p12 = pnand %p4039_p3, %p4767_p10  ;;  %p4046_p6 = scmp.lt.s32.totalorder %s4044_s30, %s4038_s7 }
 0x332   : > { %p4041_p2 = pneg %p4040_p12  ;;  %p4047_p5 = por %p4046_p6, %p4045_p4 }
 0x333   : > { %3420 = vmatmul.mubr.msk.bf16.vlgmr.msra.gmra.mxu0 %vm1457_vm1, %v1414_v23 }
 0x334   : > { %3426 = vmatmul.mubr.msk.bf16.vlgmr.msra.gmra.mxu1 %vm1457_vm1, %v1415_v24  ;;  %3430 = vmatpush3.bf16.xpose.msra.mxu0 %v1666_v19  ;;  %p4048_p1 = pnand %p4047_p5, %p4041_p2 }
 0x335   : > { %3436 = vmatpush3.bf16.xpose.msra.mxu1 %v1717_v20  ;;  %3431 = vmatprep.mubr.msk.bf16.mxu0 %vm4176_vm2, %v4175_v6 }
 0x336   : > { %3437 = vmatprep.mubr.msk.bf16.mxu1 %vm4176_vm2, %v4175_v6  ;;  %3441 = vmatprep.subr.bf16.mxu0 %v4175_v6 }
 0x337   : > { %3447 = vmatprep.subr.bf16.mxu1 %v4175_v6 }
 0x33b   : > { %3432 = vmatmul.mubr.msk.bf16.vlgmr.msra.gmra.mxu0 %vm1457_vm1, %v1416_v25 }
 0x33c   : > { %3438 = vmatmul.mubr.msk.bf16.vlgmr.msra.gmra.mxu1 %vm1457_vm1, %v1417_v26  ;;  %3442 = vmatpush3.bf16.xpose.msra.mxu0 %v1768_v21 }
 0x33d   : > { %3448 = vmatpush3.bf16.xpose.msra.mxu1 %v1819_v22  ;;  %3443 = vmatprep.mubr.msk.bf16.mxu0 %vm4176_vm2, %v4175_v6 }
 0x33e   : > { %3449 = vmatprep.mubr.msk.bf16.mxu1 %vm4176_vm2, %v4175_v6  ;;  %3453 = vmatprep.subr.bf16.mxu0 %v4175_v6 }
 0x33f   : > { %3459 = vmatprep.subr.bf16.mxu1 %v4175_v6 }
 0x343   : > { %3444 = vmatmul.mubr.msk.bf16.vlgmr.msra.gmra.mxu0 %vm1457_vm1, %v1418_v27 }
 0x344   : > { %3450 = vmatmul.mubr.msk.bf16.vlgmr.msra.gmra.mxu1 %vm1457_vm1, %v1419_v28  ;;  %3455 = vmatprep.mubr.msk.bf16.mxu0 %vm4176_vm2, %v4175_v6 }
 0x345   : > { %3461 = vmatprep.mubr.msk.bf16.mxu1 %vm4176_vm2, %v4175_v6 }
 0x3eb   : > { %v1498_v29 = vpop.f32.mrf.mxu0 }
 0x3ec   : > { %v1549_v30 = vpop.f32.mrf.mxu1  ;;  %v1862_v31 = vsel %vm1861_vm3, %v1498_v29, -inf }
 0x3ed   : > { %1863 = vmax.xlane.f32.xlu0 %v1862_v31  ;;  %v3409_v32 = vpop.f32.mrf.mxu0  ;;  %v1865_v34 = vsel %vm1861_vm3, %v1549_v30, -inf }
 0x3ee   : > { %v3415_v33 = vpop.f32.mrf.mxu1 }
 0x3ef   : > { %v1501_v35 = vpop.f32.mrf.mxu0 }
 0x3f0   : > { %v1552_v36 = vpop.f32.mrf.mxu1 }
 0x3f1   : > { %1866 = vmax.xlane.f32.xlu0 %v1865_v34  ;;  %v3410_v37 = vpop.f32.mrf.mxu0 }
 0x3f2   : > { %v3416_v38 = vpop.f32.mrf.mxu1 }
 0x3f3   : > { %v1600_v39 = vpop.f32.mrf.mxu0 }
 0x3f4   : > { %v1651_v40 = vpop.f32.mrf.mxu1  ;;  %v1868_v41 = vsel %vm1861_vm3, %v1600_v39, -inf }
 0x3f5   : > { %1869 = vmax.xlane.f32.xlu1 %v1868_v41  ;;  %v3421_v42 = vpop.f32.mrf.mxu0  ;;  %v1871_v45 = vsel %vm1861_vm3, %v1651_v40, -inf }
 0x3f6   : > { %v3427_v43 = vpop.f32.mrf.mxu1 }
 0x3f7   : > { %v1603_v46 = vpop.f32.mrf.mxu0  ;;  %v3886_v43 = vld [vmem:[#allocation4] sm:$0xff]  }
 0x3f8   : > { %v1654_v47 = vpop.f32.mrf.mxu1  ;;  %3454 = vmatpush3.bf16.msra.mxu0 %v3886_v43 }
 0x3f9   : > { %1872 = vmax.xlane.f32.xlu1 %v1871_v45  ;;  %v3422_v44 = vpop.f32.mrf.mxu0  ;;  %v3887_v45 = vld [vmem:[#allocation4 + $0x8] sm:$0xff]   ;;  %3465 = vmatprep.subr.bf16.mxu0 %v4175_v6 }
 0x3fa   : > { %v3428_v48 = vpop.f32.mrf.mxu1  ;;  %3460 = vmatpush3.bf16.msra.mxu1 %v3887_v45  ;;  %v3905_v45 = vld [vmem:[#allocation10 + $0x50] sm:$0xff]  }
 0x3fb   : > { %v1702_v49 = vpop.f32.mrf.mxu0  ;;  %3471 = vmatprep.subr.bf16.mxu1 %v4175_v6 }
 0x3fc   : > { %v1753_v50 = vpop.f32.mrf.mxu1  ;;  %v1874_v51 = vsel %vm1861_vm3, %v1702_v49, -inf }
 0x3fd   : > { %v1877_v52 = vsel %vm1861_vm3, %v1753_v50, -inf  ;;  %1875 = vmax.xlane.f32.xlu0 %v1874_v51  ;;  %v3433_v53 = vpop.f32.mrf.mxu0 }
 0x3fe   : > { %v3439_v54 = vpop.f32.mrf.mxu1  ;;  %1878 = vmax.xlane.f32.xlu1 %v1877_v52 }
 0x3ff   : > { %v1705_v55 = vpop.f32.mrf.mxu0 }
 0x400   : > { %v1756_v56 = vpop.f32.mrf.mxu1  ;;  %v3888_v55 = vld [vmem:[#allocation4 + $0x10] sm:$0xff]  }
 0x401   : > { %v3434_v57 = vpop.f32.mrf.mxu0 }
 0x402   : > { %v3440_v58 = vpop.f32.mrf.mxu1 }
 0x403   : > { %v1804_v59 = vpop.f32.mrf.mxu0 }
 0x404   : > { %v1855_v60 = vpop.f32.mrf.mxu1  ;;  %v1880_v61 = vsel %vm1861_vm3, %v1804_v59, -inf }
 0x405   : > { %v1883_v62 = vsel %vm1861_vm3, %v1855_v60, -inf  ;;  %1881 = vmax.xlane.f32.xlu0 %v1880_v61  ;;  %v3445_v0 = vpop.f32.mrf.mxu0 }
 0x406   : > { %1884 = vmax.xlane.f32.xlu1 %v1883_v62  ;;  %v3451_v1 = vpop.f32.mrf.mxu1 }
 0x407   : > { %v1807_v2 = vpop.f32.mrf.mxu0 }
 0x408   : > { %v1858_v3 = vpop.f32.mrf.mxu1  ;;  %v3890_v2 = vld [vmem:[#allocation4 + $0x20] sm:$0xff]  }
 0x409   : > { %v3446_v4 = vpop.f32.mrf.mxu0 }
 0x40a   : > { %v3452_v5 = vpop.f32.mrf.mxu1 }
 0x476   : > { %v1864_v63 = vpop.xlane.xlu0 %1863 }
 0x477   : > { %v1886_v7 = vsub.f32 %v1498_v29, %v1864_v63 }
 0x479   : > { %v1894_v8 = vmul.f32 1.442695, %v1886_v7  ;;  %v3891_v7 = vld [vmem:[#allocation4 + $0x28] sm:$0xff]  }
 0x47a   : > { %v1867_v9 = vpop.xlane.xlu0 %1866 }
 0x47b   : > { %3926 = vpow2.f32 %v1894_v8  ;;  %v1887_v10 = vsub.f32 %v1549_v30, %v1867_v9 }
 0x47d   : > { %v1896_v11 = vmul.f32 1.442695, %v1887_v10 }
 0x47e   : > { %v1870_v12 = vpop.xlane.xlu1 %1869 }
 0x47f   : > { %3928 = vpow2.f32 %v1896_v11  ;;  %v1888_v13 = vsub.f32 %v1600_v39, %v1870_v12  ;;  %v3892_v12 = vld [vmem:[#allocation4 + $0x30] sm:$0xff]  }
 0x481   : > { %v1898_v14 = vmul.f32 1.442695, %v1888_v13 }
 0x482   : > { %v1873_v15 = vpop.xlane.xlu1 %1872 }
 0x483   : > { %3930 = vpow2.f32 %v1898_v14  ;;  %v1889_v16 = vsub.f32 %v1651_v40, %v1873_v15  ;;  %v3893_v15 = vld [vmem:[#allocation4 + $0x38] sm:$0xff]  }
 0x485   : > { %v1900_v17 = vmul.f32 1.442695, %v1889_v16 }
 0x486   : > { %v1876_v18 = vpop.xlane.xlu0 %1875 }
 0x487   : > { %3932 = vpow2.f32 %v1900_v17  ;;  %v1879_v19 = vpop.xlane.xlu1 %1878  ;;  %v1890_v20 = vsub.f32 %v1702_v49, %v1876_v18 }
 0x488   : > { %v3927_v21 = vpop.eup %3926  ;;  %v1891_v22 = vsub.f32 %v1753_v50, %v1879_v19 }
 0x489   : > { %v1902_v23 = vmul.f32 1.442695, %v1890_v20  ;;  %v1910_v24 = vsel %vm1861_vm3, %v3927_v21, 0.0  ;;  %v3895_v20 = vld [vmem:[#allocation10 + $0x38] sm:$0xff]  }
 0x48a   : > { %v1904_v25 = vmul.f32 1.442695, %v1891_v22  ;;  %1911 = vadd.xlane.f32.xlu0 %v1910_v24  ;;  %v3897_v24 = vld [vmem:[#allocation10 + $0x30] sm:$0xff]  }
 0x48b   : > { %3934 = vpow2.f32 %v1902_v23  ;;  %v3894_v23 = vld [vmem:[#allocation10 + $0x18] sm:$0xff]  }
 0x48c   : > { %v3929_v26 = vpop.eup %3928  ;;  %3936 = vpow2.f32 %v1904_v25 }
 0x48d   : > { %v1913_v27 = vsel %vm1861_vm3, %v3929_v26, 0.0 }
 0x48e   : > { %1914 = vadd.xlane.f32.xlu1 %v1913_v27  ;;  %v1882_v28 = vpop.xlane.xlu0 %1881  ;;  %v3899_v27 = vld [vmem:[#allocation10 + $0x28] sm:$0xff]  }
 0x48f   : > { %v1885_v29 = vpop.xlane.xlu1 %1884  ;;  %v1892_v30 = vsub.f32 %v1804_v59, %v1882_v28  ;;  %v3898_v28 = vld [vmem:[#allocation10 + $0x8] sm:$0xff]  }
 0x490   : > { %v3931_v31 = vpop.eup %3930  ;;  %v1893_v32 = vsub.f32 %v1855_v60, %v1885_v29  ;;  %v3889_v60 = vld [vmem:[#allocation4 + $0x18] sm:$0xff]   ;;  %v3900_v29 = vld [vmem:[#allocation10] sm:$0xff]  }
 0x491   : > { %v1906_v33 = vmul.f32 1.442695, %v1892_v30  ;;  %v1916_v34 = vsel %vm1861_vm3, %v3931_v31, 0.0  ;;  %v3901_v30 = vld [vmem:[#allocation10 + $0x20] sm:$0xff]  }
 0x492   : > { %v1908_v35 = vmul.f32 1.442695, %v1893_v32  ;;  %1917 = vadd.xlane.f32.xlu0 %v1916_v34  ;;  %v3902_v32 = vld [vmem:[#allocation10 + $0x78] sm:$0xff]  }
 0x493   : > { %3938 = vpow2.f32 %v1906_v33 }
 0x494   : > { %v3933_v36 = vpop.eup %3932  ;;  %3940 = vpow2.f32 %v1908_v35 }
 0x495   : > { %v1919_v37 = vsel %vm1861_vm3, %v3933_v36, 0.0 }
 0x496   : > { %1920 = vadd.xlane.f32.xlu1 %v1919_v37  ;;  %v3903_v37 = vld [vmem:[#allocation10 + $0x58] sm:$0xff]  }
 0x498   : > { %v4553_v38 = vpop.eup %3934 }
 0x499   : > { %v4555_v39 = vpop.eup %3936  ;;  %v1922_v40 = vsel %vm1861_vm3, %v4553_v38, 0.0 }
 0x49a   : > { %v1925_v41 = vsel %vm1861_vm3, %v4555_v39, 0.0  ;;  %1923 = vadd.xlane.f32.xlu0 %v1922_v40 }
 0x49b   : > { %1926 = vadd.xlane.f32.xlu1 %v1925_v41 }
 0x4a0   : > { %v4561_v42 = vpop.eup %3938 }
 0x4a1   : > { %v4563_v46 = vpop.eup %3940  ;;  %v1928_v47 = vsel %vm1861_vm3, %v4561_v42, 0.0 }
 0x4a2   : > { %v1931_v44 = vsel %vm1861_vm3, %v4563_v46, 0.0  ;;  %1929 = vadd.xlane.f32.xlu0 %v1928_v47 }
 0x4a3   : > { %1932 = vadd.xlane.f32.xlu1 %v1931_v44 }
 0x513   : > { %v1912_v48 = vpop.xlane.xlu0 %1911 }
 0x514   : > { %3942 = vrcp.f32 %v1912_v48 }
 0x517   : > { %v1915_v49 = vpop.xlane.xlu1 %1914 }
 0x518   : > { %3944 = vrcp.f32 %v1915_v49 }
 0x51b   : > { %v1918_v50 = vpop.xlane.xlu0 %1917 }
 0x51c   : > { %3946 = vrcp.f32 %v1918_v50  ;;  %v3907_v50 = vld [vmem:[#allocation10 + $0x48] sm:$0xff]  }
 0x51f   : > { %v1921_v51 = vpop.xlane.xlu1 %1920 }
 0x520   : > { %3948 = vrcp.f32 %v1921_v51  ;;  %v3908_v51 = vld [vmem:[#allocation10 + $0x60] sm:$0xff]  }
 0x521   : > { %v3943_v52 = vpop.eup %3942 }
 0x522   : > { %v1942_v53 = vmul.f32 %v3943_v52, %v3927_v21 }
 0x523   : > { %v1924_v54 = vpop.xlane.xlu0 %1923 }
 0x524   : > { %v1927_v56 = vpop.xlane.xlu1 %1926  ;;  %3950 = vrcp.f32 %v1924_v54  ;;  %v1950_v57 = vpack.c.bf16 %v1942_v53, %v1942_v53 }
 0x525   : > { %v3945_v58 = vpop.eup %3944  ;;  %3952 = vrcp.f32 %v1927_v56  ;;  %v3909_v56 = vld [vmem:[#allocation10 + $0x40] sm:$0xff]  }
 0x526   : > { %3456 = vmatmul.mubr.msk.bf16.vlgmr.msra.gmra.mxu0 %vm1861_vm3, %v1950_v57  ;;  %v1943_v59 = vmul.f32 %v3945_v58, %v3929_v26  ;;  %v3896_v26 = vld [vmem:[#allocation10 + $0x10] sm:$0xff]   ;;  %v3910_v57 = vld [vmem:[#allocation10 + $0xb8] sm:$0xff]  }
 0x527   : > { %3466 = vmatpush3.bf16.msra.mxu0 %v3888_v55  ;;  %3467 = vmatprep.mubr.msk.bf16.mxu0 %vm4176_vm2, %v4175_v6 }
 0x528   : > { %v1951_v61 = vpack.c.bf16 %v1943_v59, %v1943_v59  ;;  %3477 = vmatprep.subr.bf16.mxu0 %v4175_v6 }
 0x529   : > { %v3947_v62 = vpop.eup %3946 }
 0x52a   : > { %3462 = vmatmul.mubr.msk.bf16.vlgmr.msra.gmra.mxu1 %vm1861_vm3, %v1951_v61  ;;  %v1944_v0 = vmul.f32 %v3947_v62, %v3931_v31 }
 0x52b   : > { %v1930_v1 = vpop.xlane.xlu0 %1929  ;;  %3472 = vmatpush3.bf16.msra.mxu1 %v3889_v60  ;;  %3473 = vmatprep.mubr.msk.bf16.mxu1 %vm4176_vm2, %v4175_v6 }
 0x52c   : > { %v1933_v3 = vpop.xlane.xlu1 %1932  ;;  %3954 = vrcp.f32 %v1930_v1  ;;  %v1952_v4 = vpack.c.bf16 %v1944_v0, %v1944_v0  ;;  %3483 = vmatprep.subr.bf16.mxu1 %v4175_v6  ;;  %v3911_v0 = vld [vmem:[#allocation10 + $0x98] sm:$0xff]   ;;  %v3912_v1 = vld [vmem:[#allocation10 + $0xb0] sm:$0xff]  }
 0x52d   : > { %v3949_v5 = vpop.eup %3948  ;;  %3956 = vrcp.f32 %v1933_v3 }
 0x52e   : > { %3468 = vmatmul.mubr.msk.bf16.vlgmr.msra.gmra.mxu0 %vm1861_vm3, %v1952_v4  ;;  %v1945_v63 = vmul.f32 %v3949_v5, %v3933_v36 }
 0x52f   : > { %3478 = vmatpush3.bf16.msra.mxu0 %v3890_v2  ;;  %3479 = vmatprep.mubr.msk.bf16.mxu0 %vm4176_vm2, %v4175_v6 }
 0x530   : > { %v1953_v8 = vpack.c.bf16 %v1945_v63, %v1945_v63  ;;  %3489 = vmatprep.subr.bf16.mxu0 %v4175_v6 }
 0x531   : > { %v3951_v9 = vpop.eup %3950 }
 0x532   : > { %v3953_v10 = vpop.eup %3952  ;;  %3474 = vmatmul.mubr.msk.bf16.vlgmr.msra.gmra.mxu1 %vm1861_vm3, %v1953_v8  ;;  %v1946_v11 = vmul.f32 %v3951_v9, %v4553_v38  ;;  %v3904_v38 = vld [vmem:[#allocation10 + $0x70] sm:$0xff]   ;;  %v3914_v8 = vld [vmem:[#allocation10 + $0xa8] sm:$0xff]  }
 0x533   : > { %3484 = vmatpush3.bf16.msra.mxu1 %v3891_v7  ;;  %3485 = vmatprep.mubr.msk.bf16.mxu1 %vm4176_vm2, %v4175_v6  ;;  %v1947_v14 = vmul.f32 %v3953_v10, %v4555_v39  ;;  %v3913_v7 = vld [vmem:[#allocation10 + $0x90] sm:$0xff]  }
 0x534   : > { %v1954_v13 = vpack.c.bf16 %v1946_v11, %v1946_v11  ;;  %3495 = vmatprep.subr.bf16.mxu1 %v4175_v6 }
 0x535   : > { %v1955_v16 = vpack.c.bf16 %v1947_v14, %v1947_v14  ;;  %v3916_v14 = vld [vmem:[#allocation10 + $0xa0] sm:$0xff]  }
 0x536   : > { %3480 = vmatmul.mubr.msk.bf16.vlgmr.msra.gmra.mxu0 %vm1861_vm3, %v1954_v13  ;;  %v3915_v13 = vld [vmem:[#allocation10 + $0x88] sm:$0xff]  }
 0x537   : > { %3490 = vmatpush3.bf16.msra.mxu0 %v3892_v12  ;;  %3491 = vmatprep.mubr.msk.bf16.mxu0 %vm4176_vm2, %v4175_v6 }
 0x538   : > { %3501 = vmatprep.subr.bf16.mxu0 %v4175_v6 }
 0x539   : > { %v3955_v17 = vpop.eup %3954 }
 0x53a   : > { %v3957_v18 = vpop.eup %3956  ;;  %3486 = vmatmul.mubr.msk.bf16.vlgmr.msra.gmra.mxu1 %vm1861_vm3, %v1955_v16  ;;  %v1948_v19 = vmul.f32 %v3955_v17, %v4561_v42 }
 0x53b   : > { %3496 = vmatpush3.bf16.msra.mxu1 %v3893_v15  ;;  %3497 = vmatprep.mubr.msk.bf16.mxu1 %vm4176_vm2, %v4175_v6  ;;  %v1949_v22 = vmul.f32 %v3957_v18, %v4563_v46  ;;  %v3906_v46 = vld [vmem:[#allocation10 + $0x68] sm:$0xff]   ;;  %v3917_v18 = vld [vmem:[#allocation10 + $0x80] sm:$0xff]  }
 0x53c   : > { %v1956_v21 = vpack.c.bf16 %v1948_v19, %v1948_v19  ;;  %3513 = vmatprep.subr.bf16.mxu1 %v4175_v6  ;;  %v3918_v19 = vld [vmem:[#allocation10 + $0xf8] sm:$0xff]  }
 0x53d   : > { %v1957_v25 = vpack.c.bf16 %v1949_v22, %v1949_v22  ;;  %v3919_v22 = vld [vmem:[#allocation10 + $0xd8] sm:$0xff]  }
 0x53e   : > { %3492 = vmatmul.mubr.msk.bf16.vlgmr.msra.gmra.mxu0 %vm1861_vm3, %v1956_v21 }
 0x53f   : > { %3502 = vmatpush3.bf16.msra.mxu0 %v3895_v20  ;;  %3509 = vmatprep.mubr.msk.bf16.mxu0 %vm4176_vm2, %v4175_v6 }
 0x540   : > { %3503 = vmatprep.subr.bf16.mxu0 %v4175_v6 }
 0x542   : > { %3498 = vmatmul.mubr.msk.bf16.vlgmr.msra.gmra.mxu1 %vm1861_vm3, %v1957_v25  ;;  %v3921_v25 = vld [vmem:[#allocation10 + $0xd0] sm:$0xff]  }
 0x543   : > { %3514 = vmatpush3.bf16.msra.mxu1 %v3894_v23  ;;  %3504 = vmatpush3.bf16.msra.mxu0 %v3897_v24  ;;  %v3920_v23 = vld [vmem:[#allocation10 + $0xf0] sm:$0xff]  }
 0x544   : > { %3515 = vmatprep.subr.bf16.mxu1 %v4175_v6  ;;  %3505 = vmatprep.subr.bf16.mxu0 %v4175_v6 }
 0x545   : > { %3521 = vmatprep.mubr.msk.bf16.mxu1 %vm4176_vm2, %v4175_v6 }
 0x547   : > { %3516 = vmatpush3.bf16.msra.mxu1 %v3896_v26  ;;  %3506 = vmatpush3.bf16.msra.mxu0 %v3899_v27  ;;  %v3922_v26 = vld [vmem:[#allocation10 + $0xe8] sm:$0xff]  }
 0x548   : > { %3517 = vmatprep.subr.bf16.mxu1 %v4175_v6  ;;  %3507 = vmatprep.subr.bf16.mxu0 %v4175_v6  ;;  %v3923_v27 = vld [vmem:[#allocation10 + $0xc8] sm:$0xff]  }
 0x54b   : > { %3518 = vmatpush3.bf16.msra.mxu1 %v3898_v28  ;;  %3508 = vmatpush3.bf16.msra.mxu0 %v3901_v30  ;;  %v3924_v28 = vld [vmem:[#allocation10 + $0xe0] sm:$0xff]  }
 0x54c   : > { %3519 = vmatprep.subr.bf16.mxu1 %v4175_v6  ;;  %3525 = vmatprep.subr.bf16.mxu0 %v4175_v6 }
 0x54f   : > { %3520 = vmatpush3.bf16.msra.mxu1 %v3900_v29  ;;  %v3925_v29 = vld [vmem:[#allocation10 + $0xc0] sm:$0xff]  }
 0x550   : > { %3537 = vmatprep.subr.bf16.mxu1 %v4175_v6 }
 0x5e6   : > { %v2001_v31 = vpop.f32.mrf.mxu0 }
 0x5e7   : > { %v2350_v33 = vpack.c.bf16 %v2001_v31, %v2001_v31 }
 0x5e8   : > { %v3457_v34 = vpop.f32.mrf.mxu0 }
 0x5e9   : > { %3522 = vmatmul.mubr.msk.bf16.vlgmr.msra.gmra.mxu1 %vm1457_vm1, %v2350_v33 }
 0x5ea   : > { %3538 = vmatpush3.bf16.msra.mxu1 %v3902_v32  ;;  %v2004_v35 = vpop.f32.mrf.mxu0  ;;  %v2050_v36 = vpop.f32.mrf.mxu1  ;;  %3545 = vmatprep.mubr.msk.bf16.mxu1 %vm4176_vm2, %v4175_v6 }
 0x5eb   : > { %v2351_v39 = vpack.c.bf16 %v2050_v36, %v2050_v36  ;;  %3539 = vmatprep.subr.bf16.mxu1 %v4175_v6 }
 0x5ec   : > { %v3458_v40 = vpop.f32.mrf.mxu0  ;;  %v3463_v41 = vpop.f32.mrf.mxu1 }
 0x5ed   : > { %3510 = vmatmul.mubr.msk.bf16.vlgmr.msra.gmra.mxu0 %vm1457_vm1, %v2351_v39 }
 0x5ee   : > { %3526 = vmatpush3.bf16.msra.mxu0 %v3903_v37  ;;  %3540 = vmatpush3.bf16.msra.mxu1 %v3904_v38  ;;  %v2053_v42 = vpop.f32.mrf.mxu1  ;;  %v2099_v43 = vpop.f32.mrf.mxu0 }
 0x5ef   : > { %3527 = vmatprep.subr.bf16.mxu0 %v4175_v6  ;;  %3541 = vmatprep.subr.bf16.mxu1 %v4175_v6  ;;  %v2352_v2 = vpack.c.bf16 %v2099_v43, %v2099_v43 }
 0x5f0   : > { %v3464_v47 = vpop.f32.mrf.mxu1  ;;  %v3469_v44 = vpop.f32.mrf.mxu0  ;;  %3533 = vmatprep.mubr.msk.bf16.mxu0 %vm4176_vm2, %v4175_v6 }
 0x5f2   : > { %3528 = vmatpush3.bf16.msra.mxu0 %v3905_v45  ;;  %3542 = vmatpush3.bf16.msra.mxu1 %v3906_v46  ;;  %v2102_v48 = vpop.f32.mrf.mxu0  ;;  %v2148_v49 = vpop.f32.mrf.mxu1 }
 0x5f3   : > { %3529 = vmatprep.subr.bf16.mxu0 %v4175_v6  ;;  %3543 = vmatprep.subr.bf16.mxu1 %v4175_v6  ;;  %v2353_v58 = vpack.c.bf16 %v2148_v49, %v2148_v49 }
 0x5f4   : > { %v3470_v52 = vpop.f32.mrf.mxu0  ;;  %v3475_v53 = vpop.f32.mrf.mxu1 }
 0x5f6   : > { %3530 = vmatpush3.bf16.msra.mxu0 %v3907_v50  ;;  %3544 = vmatpush3.bf16.msra.mxu1 %v3908_v51  ;;  %v2151_v54 = vpop.f32.mrf.mxu1  ;;  %v2197_v55 = vpop.f32.mrf.mxu0 }
 0x5f7   : > { %3531 = vmatprep.subr.bf16.mxu0 %v4175_v6  ;;  %3561 = vmatprep.subr.bf16.mxu1 %v4175_v6  ;;  %v2354_v24 = vpack.c.bf16 %v2197_v55, %v2197_v55 }
 0x5f8   : > { %v3476_v59 = vpop.f32.mrf.mxu1  ;;  %v3481_v60 = vpop.f32.mrf.mxu0 }
 0x5f9   : > { %3546 = vmatmul.mubr.msk.bf16.vlgmr.msra.gmra.mxu1 %vm1457_vm1, %v2353_v58 }
 0x5fa   : > { %3532 = vmatpush3.bf16.msra.mxu0 %v3909_v56  ;;  %3562 = vmatpush3.bf16.msra.mxu1 %v3910_v57  ;;  %v2200_v61 = vpop.f32.mrf.mxu0  ;;  %v2246_v62 = vpop.f32.mrf.mxu1 }
 0x5fb   : > { %3549 = vmatprep.subr.bf16.mxu0 %v4175_v6  ;;  %3563 = vmatprep.subr.bf16.mxu1 %v4175_v6  ;;  %v2355_v20 = vpack.c.bf16 %v2246_v62, %v2246_v62 }
 0x5fc   : > { %v3482_v3 = vpop.f32.mrf.mxu0  ;;  %v3487_v4 = vpop.f32.mrf.mxu1  ;;  %3569 = vmatprep.mubr.msk.bf16.mxu1 %vm4176_vm2, %v4175_v6 }
 0x5fd   : > { %3534 = vmatmul.mubr.msk.bf16.vlgmr.msra.gmra.mxu0 %vm1457_vm1, %v2352_v2 }
 0x5fe   : > { %3550 = vmatpush3.bf16.msra.mxu0 %v3911_v0  ;;  %3564 = vmatpush3.bf16.msra.mxu1 %v3912_v1  ;;  %v2249_v5 = vpop.f32.mrf.mxu1  ;;  %v2295_v63 = vpop.f32.mrf.mxu0 }
 0x5ff   : > { %3551 = vmatprep.subr.bf16.mxu0 %v4175_v6  ;;  %3565 = vmatprep.subr.bf16.mxu1 %v4175_v6  ;;  %v2356_v31 = vpack.c.bf16 %v2295_v63, %v2295_v63 }
 0x600   : > { %v3488_v9 = vpop.f32.mrf.mxu1  ;;  %v3493_v10 = vpop.f32.mrf.mxu0  ;;  %3557 = vmatprep.mubr.msk.bf16.mxu0 %vm4176_vm2, %v4175_v6 }
 0x602   : > { %3552 = vmatpush3.bf16.msra.mxu0 %v3913_v7  ;;  %3566 = vmatpush3.bf16.msra.mxu1 %v3914_v8  ;;  %v2298_v11 = vpop.f32.mrf.mxu0  ;;  %v2344_v12 = vpop.f32.mrf.mxu1 }
 0x603   : > { %3553 = vmatprep.subr.bf16.mxu0 %v4175_v6  ;;  %3567 = vmatprep.subr.bf16.mxu1 %v4175_v6  ;;  %v2357_v30 = vpack.c.bf16 %v2344_v12, %v2344_v12 }
 0x604   : > { %v3494_v15 = vpop.f32.mrf.mxu0  ;;  %v3499_v16 = vpop.f32.mrf.mxu1 }
 0x606   : > { %3554 = vmatpush3.bf16.msra.mxu0 %v3915_v13  ;;  %3568 = vmatpush3.bf16.msra.mxu1 %v3916_v14  ;;  %v2347_v17 = vpop.f32.mrf.mxu1 }
 0x607   : > { %3555 = vmatprep.subr.bf16.mxu0 %v4175_v6  ;;  %3585 = vmatprep.subr.bf16.mxu1 %v4175_v6 }
 0x608   : > { %v3500_v21 = vpop.f32.mrf.mxu1 }
 0x609   : > { %3570 = vmatmul.mubr.msk.bf16.vlgmr.msra.gmra.mxu1 %vm1457_vm1, %v2355_v20 }
 0x60a   : > { %3556 = vmatpush3.bf16.msra.mxu0 %v3917_v18  ;;  %3586 = vmatpush3.bf16.msra.mxu1 %v3918_v19 }
 0x60b   : > { %3573 = vmatprep.subr.bf16.mxu0 %v4175_v6  ;;  %3587 = vmatprep.subr.bf16.mxu1 %v4175_v6 }
 0x60c   : > { %3593 = vmatprep.mubr.msk.bf16.mxu1 %vm4176_vm2, %v4175_v6 }
 0x60d   : > { %3558 = vmatmul.mubr.msk.bf16.vlgmr.msra.gmra.mxu0 %vm1457_vm1, %v2354_v24 }
 0x60e   : > { %3574 = vmatpush3.bf16.msra.mxu0 %v3919_v22  ;;  %3588 = vmatpush3.bf16.msra.mxu1 %v3920_v23 }
 0x60f   : > { %3575 = vmatprep.subr.bf16.mxu0 %v4175_v6  ;;  %3589 = vmatprep.subr.bf16.mxu1 %v4175_v6 }
 0x610   : > { %3581 = vmatprep.mubr.msk.bf16.mxu0 %vm4176_vm2, %v4175_v6 }
 0x612   : > { %3576 = vmatpush3.bf16.msra.mxu0 %v3921_v25  ;;  %3590 = vmatpush3.bf16.msra.mxu1 %v3922_v26 }
 0x613   : > { %3577 = vmatprep.subr.bf16.mxu0 %v4175_v6  ;;  %3591 = vmatprep.subr.bf16.mxu1 %v4175_v6 }
 0x616   : > { %3578 = vmatpush3.bf16.msra.mxu0 %v3923_v27  ;;  %3592 = vmatpush3.bf16.msra.mxu1 %v3924_v28 }
 0x617   : > { %3579 = vmatprep.subr.bf16.mxu0 %v4175_v6 }
 0x619   : > { %3594 = vmatmul.mubr.msk.bf16.vlgmr.msra.gmra.mxu1 %vm1457_vm1, %v2357_v30 }
 0x61a   : > { %3580 = vmatpush3.bf16.msra.mxu0 %v3925_v29 }
 0x61d   : > { %3582 = vmatmul.mubr.msk.bf16.vlgmr.msra.gmra.mxu0 %vm1457_vm1, %v2356_v31 }
 0x6a9   : > { %v2503_v32 = vpop.f32.mrf.mxu1 }
 0x6ab   : > { %v3523_v33 = vpop.f32.mrf.mxu1 }
 0x6ad   : > { %v2436_v34 = vpop.f32.mrf.mxu0  ;;  %v2506_v35 = vpop.f32.mrf.mxu1 }
 0x6ae   : > { %v2504_v53 = vadd.f32 %v2503_v32, %v2436_v34 }
 0x6af   : > { %v3511_v36 = vpop.f32.mrf.mxu0  ;;  %v3524_v37 = vpop.f32.mrf.mxu1 }
 0x6b1   : > { %v2439_v38 = vpop.f32.mrf.mxu0 }
 0x6b3   : > { %v3512_v39 = vpop.f32.mrf.mxu0 }
 0x6b9   : > { %v2656_v40 = vpop.f32.mrf.mxu1 }
 0x6bb   : > { %v3547_v41 = vpop.f32.mrf.mxu1 }
 0x6bd   : > { %v2579_v42 = vpop.f32.mrf.mxu0  ;;  %v2659_v43 = vpop.f32.mrf.mxu1 }
 0x6be   : > { %v2585_v55 = vadd.f32 %v2579_v42, %v2504_v53 }
 0x6bf   : > { %v3535_v6 = vpop.f32.mrf.mxu0  ;;  %v3548_v45 = vpop.f32.mrf.mxu1 }
 0x6c0   : > { %v2662_v57 = vadd.f32 %v2656_v40, %v2585_v55 }
 0x6c1   : > { %v2582_v46 = vpop.f32.mrf.mxu0 }
 0x6c3   : > { %v3536_v47 = vpop.f32.mrf.mxu0 }
 0x6c9   : > { %v2810_v44 = vpop.f32.mrf.mxu1 }
 0x6cb   : > { %v3571_v48 = vpop.f32.mrf.mxu1 }
 0x6cd   : > { %v2733_v49 = vpop.f32.mrf.mxu0  ;;  %v2813_v50 = vpop.f32.mrf.mxu1 }
 0x6ce   : > { %v2739_v58 = vadd.f32 %v2733_v49, %v2662_v57 }
 0x6cf   : > { %v3559_v51 = vpop.f32.mrf.mxu0  ;;  %v3572_v52 = vpop.f32.mrf.mxu1 }
 0x6d0   : > { %v2816_v61 = vadd.f32 %v2810_v44, %v2739_v58 }
 0x6d1   : > { %v2736_v54 = vpop.f32.mrf.mxu0 }
 0x6d3   : > { %v3560_v56 = vpop.f32.mrf.mxu0 }
 0x6d9   : > { %v2964_v59 = vpop.f32.mrf.mxu1 }
 0x6db   : > { %v3595_v60 = vpop.f32.mrf.mxu1 }
 0x6dd   : > { %v2887_v62 = vpop.f32.mrf.mxu0  ;;  %v2967_v0 = vpop.f32.mrf.mxu1 }
 0x6de   : > { %v2893_v1 = vadd.f32 %v2887_v62, %v2816_v61 }
 0x6df   : > { %v3583_v2 = vpop.f32.mrf.mxu0  ;;  %v3596_v3 = vpop.f32.mrf.mxu1 }
 0x6e0   : > { %v2970_v4 = vadd.f32 %v2964_v59, %v2893_v1 }
 0x6e1   : > { %v2890_v5 = vpop.f32.mrf.mxu0 }
 0x6e2   : > { %2971 = vst [vmem:[%s285_s10] sm:$0xff] %v2970_v4 }
 0x6e3   : > { %v3584_v63 = vpop.f32.mrf.mxu0 }
 0x6e4   : > { %4051 = shalt.err (!%p4048_p1)
}
 0x6e5   : > { %s4052_s9 = scalar_lea.hbm %s4662_s29, 128  ;;  %s4056_s15 = scalar_lea.hbm %s4766_s11, 512 }
 0x6e6   : > { %p4053_p7 = scmp.ne.s32.totalorder %s4662_s29, %s4052_s9  ;;  %p4057_p0 = scmp.lt.s32.totalorder %s4662_s29, %s4766_s11 }
 0x6e7   : > { %p4058_p8 = scmp.lt.s32.totalorder %s4056_s15, %s4052_s9 }
 0x6e8   : > { %p4054_p9 = pnand %p4053_p7, %p4767_p10 }
 0x6e9   : > { %p4059_p11 = por %p4058_p8, %p4057_p0 }
 0x6ea   : > { %p4055_p13 = pneg %p4054_p9 }
 0x6ec   : > { %p4060_p3 = pnand %p4059_p11, %p4055_p13 }
 0x6ee   : > { %4063 = shalt.err (!%p4060_p3)
}
 0x6ef   : > { %3607 = dma.vmem_to_hbm [thread:$0]  (%p4767_p10), %s4664_s13, 128, %s4662_s29, %s2973_s24  }
 0x6f0 PF: > { %s4768_s21 = sld [smem:[#allocation15_spill]]  ;;  %p3629_p12 = scmp.ge.s32.totalorder %s4162_s28, 2 }
 0x6f1   : > { %s4769_s17 = sld [smem:[#allocation19_spill]] }
 0x6f6   : > { %s3000_s6 = sand.u32 1, %s4768_s21  }
 0x6f7   : > { %p4770_p2 = scmp.ne.s32.totalorder %s4769_s17, 0  ;;  %s3001_s8 = scalar_lea.sflag [#allocation7], %s3000_s6 }
 0x6f9   : > { %p3621_p4 = pnand %p3629_p12, %p4770_p2 }
 0x6fb   : > { %p3622_p6 = pneg %p3621_p4 }
 0x6fd   : > { %4117 = dma.done.wait (%p3622_p6), %s3001_s8, 128  }
 0x6fe   : > { %4119 = vsyncadd (%p3622_p6), %s3001_s8, 4294967168  ;;  %s22_s28 = sadd.s32 1, %s4162_s28   ;;  %s4771_s16 = smov %s4345_s18 }
 0x6ff   : > { %p19_p5 = scmp.ge.s32.totalorder %s22_s28, 6   ;;  %s4772_s24 = sld [smem:[#allocation17_spill]] }
 0x700   : > { %s4773_s13 = sld [smem:[#allocation20_spill]]  ;;  %s4774_s18 = smov %s4126_s19 }
 0x701   : > { %s4775_s19 = smov %s4130_s20  ;;  %s4776_s20 = smov %s4350_s26 }
 0x702   : > { %s4777_s21 = smov %s4138_s22  ;;  %s4778_s22 = smov %s4142_s23 }
 0x703   : > { %s4779_s23 = smov %s4771_s16  ;;  %s4780_s25 = smov %s4158_s27 }
 0x704   : > { %s4782_s27 = smov %s4788_s12  ;;  %21 = sbr.rel (!%p19_p5) target bundleno = 14 (0xe), region = 126 }
 0x706   : > { %s4781_s26 = smov %s4773_s13 }
 0x709   :  { %3006 = vsyncpa [#allocation6], 1 }
 0x70a   :  { %3008 = vsyncpa [#allocation6 + $0x1], 1 }
 0x70b   :  { %3009 = vsyncpa [#allocation9], 1 }
 0x70c   :  { %3010 = vsyncpa [#allocation7], 1 }
 0x70d   :  { %3012 = vsyncpa [#allocation7 + $0x1], 1 }

</bundles_post_ra>
